<compile_context>
chip_gen: v5e
topology: v5e:2x2
jax: 0.10.0
libtpu: 0.0.40
codegen_flags: <defaults>
</compile_context>

<pallas_src>
import functools
import math

import jax
import jax.numpy as jnp
from jax.experimental import pallas as pl
from jax.experimental.pallas import tpu as pltpu

LN_EPS = 1e-12        # DistilBERT LayerNorm eps
TM, TN, TK = 512, 512, 512   # tile caps (rows, out-cols, reduction)
VMEM_LIMIT = 64 * 1024 * 1024


def _pick_tile(dim, cap, align):
    """Largest tile <= cap that divides dim (full dim if it already fits)."""
    if dim <= cap:
        return dim
    t = (cap // align) * align
    while t >= align:
        if dim % t == 0:
            return t
        t -= align
    return dim


# ---------------------------- dense (matmul + bias [+ GELU]) ----------------

def _dense_kernel(x_ref, w_ref, b_ref, o_ref, acc_ref, *, activation, n_k):
    @pl.when(pl.program_id(2) == 0)
    def _():
        acc_ref[...] = jnp.zeros_like(acc_ref)

    acc_ref[...] += jnp.dot(x_ref[...], w_ref[...],
                            preferred_element_type=jnp.float32)

    @pl.when(pl.program_id(2) == n_k - 1)
    def _():
        y = acc_ref[...] + b_ref[...].astype(jnp.float32)
        if activation == "gelu":
            # exact (erf) GELU, matching torch.nn.GELU inside DistilBERT FFN
            y = 0.5 * y * (1.0 + jax.lax.erf(y * (1.0 / math.sqrt(2.0))))
        o_ref[...] = y.astype(o_ref.dtype)


def dense(x2d, w, b, activation=None):
    """x2d: [M, K] @ w: [K, N] + b: [N] -> [M, N] (optionally fused GELU)."""
    M, K = x2d.shape
    N = w.shape[1]
    tm = _pick_tile(M, TM, 8)
    tn = _pick_tile(N, TN, 128)
    tk = _pick_tile(K, TK, 128)
    n_m, n_n, n_k = M // tm, N // tn, K // tk
    kernel = functools.partial(_dense_kernel, activation=activation, n_k=n_k)
    return pl.pallas_call(
        kernel,
        out_shape=jax.ShapeDtypeStruct((M, N), x2d.dtype),
        grid_spec=pltpu.PrefetchScalarGridSpec(
            num_scalar_prefetch=0,
            grid=(n_m, n_n, n_k),
            in_specs=[pl.BlockSpec((tm, tk), lambda i, j, k: (i, k)),
                      pl.BlockSpec((tk, tn), lambda i, j, k: (k, j)),
                      pl.BlockSpec((1, tn), lambda i, j, k: (0, j))],
            out_specs=pl.BlockSpec((tm, tn), lambda i, j, k: (i, j)),
            scratch_shapes=[pltpu.VMEM((tm, tn), jnp.float32)]),
        compiler_params=pltpu.CompilerParams(
            dimension_semantics=("parallel", "parallel", "arbitrary"),
            vmem_limit_bytes=VMEM_LIMIT),
    )(x2d, w, b.reshape(1, N))


# ---------------- dense + residual + LayerNorm (optional fused fc) ----------

def _dense_res_ln_kernel(*refs, eps, n_k, with_fc):
    if with_fc:
        (x_ref, w_ref, b_ref, res_ref, g_ref, bln_ref, fcw_ref, fcb_ref,
         o_ref, lg_ref, acc_ref) = refs
    else:
        x_ref, w_ref, b_ref, res_ref, g_ref, bln_ref, o_ref, acc_ref = refs

    @pl.when(pl.program_id(1) == 0)
    def _():
        acc_ref[...] = jnp.zeros_like(acc_ref)

    acc_ref[...] += jnp.dot(x_ref[...], w_ref[...],
                            preferred_element_type=jnp.float32)

    @pl.when(pl.program_id(1) == n_k - 1)
    def _():
        y = (acc_ref[...] + b_ref[...].astype(jnp.float32)
             + res_ref[...].astype(jnp.float32))
        mean = jnp.mean(y, axis=-1, keepdims=True)
        var = jnp.mean(jnp.square(y - mean), axis=-1, keepdims=True)
        yn = (y - mean) * jax.lax.rsqrt(var + eps)
        yn = yn * g_ref[...].astype(jnp.float32) + bln_ref[...].astype(jnp.float32)
        o_ref[...] = yn.astype(o_ref.dtype)
        if with_fc:
            # fc: Linear(D, 1) as an in-kernel row reduction (fc_w is [1, D])
            lg = (jnp.sum(yn * fcw_ref[...].astype(jnp.float32),
                          axis=-1, keepdims=True)
                  + fcb_ref[...].astype(jnp.float32))
            lg_ref[...] = lg.astype(lg_ref.dtype)


def dense_res_ln(x2d, w, b, residual, gamma, beta, fc_w=None, fc_b=None,
                 eps=LN_EPS):
    """LayerNorm(x2d @ w + b + residual); optionally also logits = LN(...) @ fc."""
    M, K = x2d.shape
    N = w.shape[1]
    tm = _pick_tile(M, TM, 8)
    tk = _pick_tile(K, TK, 128)
    n_m, n_k = M // tm, K // tk
    with_fc = fc_w is not None

    in_specs = [pl.BlockSpec((tm, tk), lambda i, k: (i, k)),
                pl.BlockSpec((tk, N), lambda i, k: (k, 0)),
                pl.BlockSpec((1, N), lambda i, k: (0, 0)),
                pl.BlockSpec((tm, N), lambda i, k: (i, 0)),
                pl.BlockSpec((1, N), lambda i, k: (0, 0)),
                pl.BlockSpec((1, N), lambda i, k: (0, 0))]
    inputs = [x2d, w, b.reshape(1, N), residual,
              gamma.reshape(1, N), beta.reshape(1, N)]
    out_shape = [jax.ShapeDtypeStruct((M, N), x2d.dtype)]
    out_specs = [pl.BlockSpec((tm, N), lambda i, k: (i, 0))]
    if with_fc:
        in_specs += [pl.BlockSpec((1, N), lambda i, k: (0, 0)),
                     pl.BlockSpec((1, 1), lambda i, k: (0, 0))]
        inputs += [fc_w.reshape(1, N), fc_b.reshape(1, 1)]
        out_shape += [jax.ShapeDtypeStruct((M, 1), jnp.float32)]
        out_specs += [pl.BlockSpec((tm, 1), lambda i, k: (i, 0))]

    kernel = functools.partial(_dense_res_ln_kernel, eps=eps, n_k=n_k,
                               with_fc=with_fc)
    result = pl.pallas_call(
        kernel,
        out_shape=out_shape if with_fc else out_shape[0],
        grid_spec=pltpu.PrefetchScalarGridSpec(
            num_scalar_prefetch=0,
            grid=(n_m, n_k),
            in_specs=in_specs,
            out_specs=out_specs if with_fc else out_specs[0],
            scratch_shapes=[pltpu.VMEM((tm, N), jnp.float32)]),
        compiler_params=pltpu.CompilerParams(
            dimension_semantics=("parallel", "arbitrary"),
            vmem_limit_bytes=VMEM_LIMIT),
    )(*inputs)
    if with_fc:
        return result[0], result[1]
    return result


# ---------------------------- standalone LayerNorm (embeddings) -------------

def _layernorm_kernel(x_ref, g_ref, b_ref, o_ref, *, eps):
    x = x_ref[...].astype(jnp.float32)
    mean = jnp.mean(x, axis=-1, keepdims=True)
    var = jnp.mean(jnp.square(x - mean), axis=-1, keepdims=True)
    y = (x - mean) * jax.lax.rsqrt(var + eps)
    o_ref[...] = (y * g_ref[...] + b_ref[...]).astype(o_ref.dtype)


def layer_norm(x2d, gamma, beta, eps=LN_EPS):
    M, D = x2d.shape
    tm = _pick_tile(M, TM, 8)
    return pl.pallas_call(
        functools.partial(_layernorm_kernel, eps=eps),
        out_shape=jax.ShapeDtypeStruct((M, D), x2d.dtype),
        grid_spec=pltpu.PrefetchScalarGridSpec(
            num_scalar_prefetch=0,
            grid=(M // tm,),
            in_specs=[pl.BlockSpec((tm, D), lambda i: (i, 0)),
                      pl.BlockSpec((1, D), lambda i: (0, 0)),
                      pl.BlockSpec((1, D), lambda i: (0, 0))],
            out_specs=pl.BlockSpec((tm, D), lambda i: (i, 0))),
        compiler_params=pltpu.CompilerParams(
            dimension_semantics=("parallel",),
            vmem_limit_bytes=VMEM_LIMIT),
    )(x2d, gamma.reshape(1, D), beta.reshape(1, D))


# ---------------------------- multi-head attention --------------------------

def _attention_kernel(qkv_ref, mask_ref, o_ref, *, n_heads, d_head, scale):
    D = n_heads * d_head
    qkv = qkv_ref[...]                      # [S, 3D], native dtype
    keep = mask_ref[0] != 0.0               # [1, S]  (broadcast over query rows)
    neg = jnp.finfo(jnp.float32).min        # HF masked_fill(finfo.min) semantics
    ctx = []
    for h in range(n_heads):
        q = qkv[:, h * d_head:(h + 1) * d_head]
        k = qkv[:, D + h * d_head:D + (h + 1) * d_head]
        v = qkv[:, 2 * D + h * d_head:2 * D + (h + 1) * d_head]
        # contract on the head dim without an explicit transpose
        s = jax.lax.dot_general(q, k, (((1,), (1,)), ((), ())),
                                preferred_element_type=jnp.float32) * scale
        s = jnp.where(keep, s, neg)
        m = jnp.max(s, axis=-1, keepdims=True)
        p = jnp.exp(s - m)
        denom = jnp.sum(p, axis=-1, keepdims=True)
        w = p * pl.reciprocal(denom, approx=True)      # divide on the EUP slot
        ctx.append(jnp.dot(w.astype(v.dtype), v,
                           preferred_element_type=jnp.float32))
    o_ref[...] = jnp.concatenate(ctx, axis=-1).astype(o_ref.dtype)


def attention(qkv, mask3d, B, S, H, Dh):
    """qkv: [B*S, 3D] fused projections; mask3d: [B, 1, S] -> ctx [B*S, D]."""
    D = H * Dh
    kernel = functools.partial(_attention_kernel, n_heads=H, d_head=Dh,
                               scale=1.0 / math.sqrt(Dh))
    return pl.pallas_call(
        kernel,
        out_shape=jax.ShapeDtypeStruct((B * S, D), qkv.dtype),
        grid_spec=pltpu.PrefetchScalarGridSpec(
            num_scalar_prefetch=0,
            grid=(B,),
            in_specs=[pl.BlockSpec((S, 3 * D), lambda b: (b, 0)),
                      pl.BlockSpec((1, 1, S), lambda b: (b, 0, 0))],
            out_specs=pl.BlockSpec((S, D), lambda b: (b, 0))),
        compiler_params=pltpu.CompilerParams(
            dimension_semantics=("parallel",),
            vmem_limit_bytes=VMEM_LIMIT),
    )(qkv, mask3d)


# ---------------------------- model wrapper ----------------------------

def transformer_block(layer, x2d, mask3d, B, S, H, Dh, fc_w=None, fc_b=None):
    # fused QKV projection: one kernel, one read of x2d
    qkv = dense(x2d, layer["qkv_w"], layer["qkv_b"])           # [B*S, 3D]
    ctx = attention(qkv, mask3d, B, S, H, Dh)                  # [B*S, D]
    # attention output projection + residual + post-LN (fused)
    sa = dense_res_ln(ctx, layer["o_w"], layer["o_b"], x2d,
                      layer["sa_ln_g"], layer["sa_ln_b"])
    # FFN: dense+GELU, then dense + residual + post-LN (fused; optional fc)
    h = dense(sa, layer["ff1_w"], layer["ff1_b"], activation="gelu")
    return dense_res_ln(h, layer["ff2_w"], layer["ff2_b"], sa,
                        layer["out_ln_g"], layer["out_ln_b"],
                        fc_w=fc_w, fc_b=fc_b)


def custom_model_forward(cfg, params, input_ids, attention_mask):
    B, S = input_ids.shape
    D, H = cfg["dim"], cfg["n_heads"]
    Dh = D // H

    # DistilBERT embeddings: gather is glue; LayerNorm runs in Pallas.
    pos_ids = jnp.arange(S)
    emb = (jnp.take(params["word_emb"], input_ids, axis=0)
           + jnp.take(params["pos_emb"], pos_ids, axis=0)[None, :, :])
    x2d = layer_norm(emb.reshape(B * S, D),
                     params["emb_ln_g"], params["emb_ln_b"])

    # mask kept at [B, 1, S]; heads read it via index_map (no jnp.repeat)
    mask3d = attention_mask.astype(jnp.float32).reshape(B, 1, S)

    n_layers = len(params["layers"])
    logits = None
    for li, layer in enumerate(params["layers"]):
        if li == n_layers - 1:
            # fc_dropout is identity in eval; fc fused into last layer epilogue
            x2d, logits = transformer_block(layer, x2d, mask3d, B, S, H, Dh,
                                            fc_w=params["fc_w"],
                                            fc_b=params["fc_b"])
        else:
            x2d = transformer_block(layer, x2d, mask3d, B, S, H, Dh)
    return logits.reshape(B, S, 1)


# ---------------------------- parameter init ----------------------------

def init_params(key, cfg):
    D, F = cfg["dim"], cfg["hidden_dim"]
    V, P, L = cfg["vocab_size"], cfg["max_position_embeddings"], cfg["n_layers"]
    std = cfg["initializer_range"]
    keys = iter(jax.random.split(key, 8 + 4 * L))

    def nrm(shape):
        return jax.random.normal(next(keys), shape, jnp.float32) * std

    params = {
        "word_emb": nrm((V, D)),
        "pos_emb": nrm((P, D)),
        "emb_ln_g": jnp.ones((D,), jnp.float32),
        "emb_ln_b": jnp.zeros((D,), jnp.float32),
        "layers": [],
        "fc_w": nrm((1, D)),                       # normal(0, initializer_range)
        "fc_b": jnp.zeros((1,), jnp.float32),      # zeroed bias (per _init_weights)
    }
    for _ in range(L):
        params["layers"].append({
            "qkv_w": nrm((D, 3 * D)), "qkv_b": jnp.zeros((3 * D,), jnp.float32),
            "o_w": nrm((D, D)), "o_b": jnp.zeros((D,), jnp.float32),
            "sa_ln_g": jnp.ones((D,), jnp.float32),
            "sa_ln_b": jnp.zeros((D,), jnp.float32),
            "ff1_w": nrm((D, F)), "ff1_b": jnp.zeros((F,), jnp.float32),
            "ff2_w": nrm((F, D)), "ff2_b": jnp.zeros((D,), jnp.float32),
            "out_ln_g": jnp.ones((D,), jnp.float32),
            "out_ln_b": jnp.zeros((D,), jnp.float32),
        })
    return params


# ---------------------------- main ----------------------------

if __name__ == "__main__":
    # Small DistilBERT-like config.
    cfg = dict(vocab_size=100, dim=32, n_heads=4, hidden_dim=64, n_layers=2,
               max_position_embeddings=16, initializer_range=0.02)

    B, S = 2, 8
    root = jax.random.PRNGKey(0)
    k_params, k_ids = jax.random.split(root)

    params = init_params(k_params, cfg)
    input_ids = jax.random.randint(k_ids, (B, S), 0, cfg["vocab_size"],
                                   dtype=jnp.int32)
    attention_mask = jnp.ones((B, S), dtype=jnp.int32)
    attention_mask = attention_mask.at[1, 6:].set(0)   # pad last 2 tokens of row 1

    forward = jax.jit(functools.partial(custom_model_forward, cfg))
    out = forward(params, input_ids, attention_mask)
    jax.block_until_ready(out)

    assert out.shape == (B, S, 1), out.shape
    assert out.dtype == jnp.float32
    assert bool(jnp.all(jnp.isfinite(out)))
    print("KERNEL_OK")
</pallas_src>

<mosaic_0001>
module attributes {stable_mosaic.version = 11 : i64} {
  func.func @_layernorm_kernel(%arg0: i32, %arg1: memref<16x32xf32, #tpu.memory_space<vmem>>, %arg2: memref<1x32xf32, #tpu.memory_space<vmem>>, %arg3: memref<1x32xf32, #tpu.memory_space<vmem>>, %arg4: memref<16x32xf32, #tpu.memory_space<vmem>>) attributes {dimension_semantics = [#tpu.dimension_semantics<parallel>], iteration_bounds = array<i64: 1>, scalar_prefetch = 0 : i64, scratch_operands = 0 : i64, tpu.core_type = #tpu.core_type<tc>, window_params = [{transform_indices = @transform_0, window_bounds = array<i64: 16, 32>}, {pipeline_mode = #tpu.pipeline_mode<synchronous>, transform_indices = @transform_1, window_bounds = array<i64: 1, 32>}, {pipeline_mode = #tpu.pipeline_mode<synchronous>, transform_indices = @transform_2, window_bounds = array<i64: 1, 32>}, {transform_indices = @transform_3, window_bounds = array<i64: 16, 32>}]} {
    %c0 = arith.constant 0 : index
    %c0_0 = arith.constant 0 : index
    %0 = vector.load %arg1[%c0, %c0_0] : memref<16x32xf32, #tpu.memory_space<vmem>>, vector<16x32xf32>
    %cst = arith.constant dense<0.000000e+00> : vector<16xf32>
    %1 = vector.multi_reduction <add>, %0, %cst [1] : vector<16x32xf32> to vector<16xf32>
    %2 = vector.shape_cast %1 : vector<16xf32> to vector<16x1xf32>
    %cst_1 = arith.constant 3.200000e+01 : f32
    %3 = vector.broadcast %cst_1 : f32 to vector<16x1xf32>
    %4 = arith.divf %2, %3 : vector<16x1xf32>
    %5 = vector.broadcast %4 : vector<16x1xf32> to vector<16x32xf32>
    %6 = arith.subf %0, %5 : vector<16x32xf32>
    %7 = arith.mulf %6, %6 : vector<16x32xf32>
    %cst_2 = arith.constant dense<0.000000e+00> : vector<16xf32>
    %8 = vector.multi_reduction <add>, %7, %cst_2 [1] : vector<16x32xf32> to vector<16xf32>
    %9 = vector.shape_cast %8 : vector<16xf32> to vector<16x1xf32>
    %cst_3 = arith.constant 3.200000e+01 : f32
    %10 = vector.broadcast %cst_3 : f32 to vector<16x1xf32>
    %11 = arith.divf %9, %10 : vector<16x1xf32>
    %12 = vector.broadcast %4 : vector<16x1xf32> to vector<16x32xf32>
    %13 = arith.subf %0, %12 : vector<16x32xf32>
    %cst_4 = arith.constant 9.99999996E-13 : f32
    %14 = vector.broadcast %cst_4 : f32 to vector<16x1xf32>
    %15 = arith.addf %11, %14 : vector<16x1xf32>
    %16 = math.rsqrt %15 : vector<16x1xf32>
    %17 = vector.broadcast %16 : vector<16x1xf32> to vector<16x32xf32>
    %18 = arith.mulf %13, %17 : vector<16x32xf32>
    %c0_5 = arith.constant 0 : index
    %c0_6 = arith.constant 0 : index
    %19 = vector.load %arg2[%c0_5, %c0_6] : memref<1x32xf32, #tpu.memory_space<vmem>>, vector<1x32xf32>
    %20 = vector.broadcast %19 : vector<1x32xf32> to vector<16x32xf32>
    %21 = arith.mulf %18, %20 : vector<16x32xf32>
    %c0_7 = arith.constant 0 : index
    %c0_8 = arith.constant 0 : index
    %22 = vector.load %arg3[%c0_7, %c0_8] : memref<1x32xf32, #tpu.memory_space<vmem>>, vector<1x32xf32>
    %23 = vector.broadcast %22 : vector<1x32xf32> to vector<16x32xf32>
    %24 = arith.addf %21, %23 : vector<16x32xf32>
    %c0_9 = arith.constant 0 : index
    %c0_10 = arith.constant 0 : index
    %25 = vector.load %arg4[%c0_9, %c0_10] : memref<16x32xf32, #tpu.memory_space<vmem>>, vector<16x32xf32>
    tpu.vector_store %arg4[%c0_9, %c0_10], %24 {strides = array<i32>} : memref<16x32xf32, #tpu.memory_space<vmem>>, vector<16x32xf32>,
    return
  }
  func.func @transform_0(%arg0: i32) -> (i32, i32) {
    %c0_i32 = arith.constant 0 : i32
    %c0_i32_0 = arith.constant 0 : i32
    return %arg0, %c0_i32 : i32, i32
  }
  func.func @transform_1(%arg0: i32) -> (i32, i32) {
    %c0_i32 = arith.constant 0 : i32
    %c0_i32_0 = arith.constant 0 : i32
    %c0_i32_1 = arith.constant 0 : i32
    return %c0_i32, %c0_i32_0 : i32, i32
  }
  func.func @transform_2(%arg0: i32) -> (i32, i32) {
    %c0_i32 = arith.constant 0 : i32
    %c0_i32_0 = arith.constant 0 : i32
    %c0_i32_1 = arith.constant 0 : i32
    return %c0_i32, %c0_i32_0 : i32, i32
  }
  func.func @transform_3(%arg0: i32) -> (i32, i32) {
    %c0_i32 = arith.constant 0 : i32
    %c0_i32_0 = arith.constant 0 : i32
    return %arg0, %c0_i32 : i32, i32
  }
}

module attributes {stable_mosaic.version = 11 : i64} {
  func.func @_dense_kernel(%arg0: i32, %arg1: i32, %arg2: i32, %arg3: memref<16x32xf32, #tpu.memory_space<vmem>>, %arg4: memref<32x96xf32, #tpu.memory_space<vmem>>, %arg5: memref<1x96xf32, #tpu.memory_space<vmem>>, %arg6: memref<16x96xf32, #tpu.memory_space<vmem>>, %arg7: memref<16x96xf32, #tpu.memory_space<vmem>>) attributes {dimension_semantics = [#tpu.dimension_semantics<parallel>, #tpu.dimension_semantics<parallel>, #tpu.dimension_semantics<arbitrary>], iteration_bounds = array<i64: 1, 1, 1>, scalar_prefetch = 0 : i64, scratch_operands = 1 : i64, tpu.core_type = #tpu.core_type<tc>, window_params = [{transform_indices = @transform_0, window_bounds = array<i64: 16, 32>}, {transform_indices = @transform_1, window_bounds = array<i64: 32, 96>}, {transform_indices = @transform_2, window_bounds = array<i64: 1, 96>}, {transform_indices = @transform_3, window_bounds = array<i64: 16, 96>}]} {
    %c0_i32 = arith.constant 0 : i32
    %0 = arith.cmpi eq, %arg2, %c0_i32 : i32
    %1 = arith.extui %0 : i1 to i32
    %c0_i32_0 = arith.constant 0 : i32
    %2 = arith.cmpi ne, %1, %c0_i32_0 : i32
    scf.if %2 {
      %cst_10 = arith.constant 0.000000e+00 : f32
      %12 = vector.broadcast %cst_10 : f32 to vector<16x96xf32>
      %c0_11 = arith.constant 0 : index
      %c0_12 = arith.constant 0 : index
      %13 = vector.load %arg7[%c0_11, %c0_12] : memref<16x96xf32, #tpu.memory_space<vmem>>, vector<16x96xf32>
      tpu.vector_store %arg7[%c0_11, %c0_12], %12 {strides = array<i32>} : memref<16x96xf32, #tpu.memory_space<vmem>>, vector<16x96xf32>,
    } else {
    }
    %c0 = arith.constant 0 : index
    %c0_1 = arith.constant 0 : index
    %3 = vector.load %arg7[%c0, %c0_1] : memref<16x96xf32, #tpu.memory_space<vmem>>, vector<16x96xf32>
    %c0_2 = arith.constant 0 : index
    %c0_3 = arith.constant 0 : index
    %4 = vector.load %arg3[%c0_2, %c0_3] : memref<16x32xf32, #tpu.memory_space<vmem>>, vector<16x32xf32>
    %c0_4 = arith.constant 0 : index
    %c0_5 = arith.constant 0 : index
    %5 = vector.load %arg4[%c0_4, %c0_5] : memref<32x96xf32, #tpu.memory_space<vmem>>, vector<32x96xf32>
    %cst = arith.constant dense<0.000000e+00> : vector<16x96xf32>
    %6 = tpu.matmul %4, %5, %cst {dimension_numbers = #tpu.dot_dimension_numbers<[1], [0], [0], [1], [0, 0, 1, 1], [], []>} : vector<16x32xf32>, vector<32x96xf32>, vector<16x96xf32> -> vector<16x96xf32>
    %7 = arith.addf %3, %6 : vector<16x96xf32>
    %c0_6 = arith.constant 0 : index
    %c0_7 = arith.constant 0 : index
    %8 = vector.load %arg7[%c0_6, %c0_7] : memref<16x96xf32, #tpu.memory_space<vmem>>, vector<16x96xf32>
    tpu.vector_store %arg7[%c0_6, %c0_7], %7 {strides = array<i32>} : memref<16x96xf32, #tpu.memory_space<vmem>>, vector<16x96xf32>,
    %c0_i32_8 = arith.constant 0 : i32
    %9 = arith.cmpi eq, %arg2, %c0_i32_8 : i32
    %10 = arith.extui %9 : i1 to i32
    %c0_i32_9 = arith.constant 0 : i32
    %11 = arith.cmpi ne, %10, %c0_i32_9 : i32
    scf.if %11 {
      %c0_10 = arith.constant 0 : index
      %c0_11 = arith.constant 0 : index
      %12 = vector.load %arg7[%c0_10, %c0_11] : memref<16x96xf32, #tpu.memory_space<vmem>>, vector<16x96xf32>
      %c0_12 = arith.constant 0 : index
      %c0_13 = arith.constant 0 : index
      %13 = vector.load %arg5[%c0_12, %c0_13] : memref<1x96xf32, #tpu.memory_space<vmem>>, vector<1x96xf32>
      %14 = vector.broadcast %13 : vector<1x96xf32> to vector<16x96xf32>
      %15 = arith.addf %12, %14 : vector<16x96xf32>
      %c0_14 = arith.constant 0 : index
      %c0_15 = arith.constant 0 : index
      %16 = vector.load %arg6[%c0_14, %c0_15] : memref<16x96xf32, #tpu.memory_space<vmem>>, vector<16x96xf32>
      tpu.vector_store %arg6[%c0_14, %c0_15], %15 {strides = array<i32>} : memref<16x96xf32, #tpu.memory_space<vmem>>, vector<16x96xf32>,
    } else {
    }
    return
  }
  func.func @transform_0(%arg0: i32, %arg1: i32, %arg2: i32) -> (i32, i32) {
    %c0_i32 = arith.constant 0 : i32
    return %arg0, %arg2 : i32, i32
  }
  func.func @transform_1(%arg0: i32, %arg1: i32, %arg2: i32) -> (i32, i32) {
    %c0_i32 = arith.constant 0 : i32
    return %arg2, %arg1 : i32, i32
  }
  func.func @transform_2(%arg0: i32, %arg1: i32, %arg2: i32) -> (i32, i32) {
    %c0_i32 = arith.constant 0 : i32
    %c0_i32_0 = arith.constant 0 : i32
    return %c0_i32, %arg1 : i32, i32
  }
  func.func @transform_3(%arg0: i32, %arg1: i32, %arg2: i32) -> (i32, i32) {
    %c0_i32 = arith.constant 0 : i32
    return %arg0, %arg1 : i32, i32
  }
}

module attributes {stable_mosaic.version = 11 : i64} {
  func.func @_dense_res_ln_kernel(%arg0: i32, %arg1: i32, %arg2: memref<16x32xf32, #tpu.memory_space<vmem>>, %arg3: memref<32x32xf32, #tpu.memory_space<vmem>>, %arg4: memref<1x32xf32, #tpu.memory_space<vmem>>, %arg5: memref<16x32xf32, #tpu.memory_space<vmem>>, %arg6: memref<1x32xf32, #tpu.memory_space<vmem>>, %arg7: memref<1x32xf32, #tpu.memory_space<vmem>>, %arg8: memref<16x32xf32, #tpu.memory_space<vmem>>, %arg9: memref<16x32xf32, #tpu.memory_space<vmem>>) attributes {dimension_semantics = [#tpu.dimension_semantics<parallel>, #tpu.dimension_semantics<arbitrary>], iteration_bounds = array<i64: 1, 1>, scalar_prefetch = 0 : i64, scratch_operands = 1 : i64, tpu.core_type = #tpu.core_type<tc>, window_params = [{transform_indices = @transform_0, window_bounds = array<i64: 16, 32>}, {transform_indices = @transform_1, window_bounds = array<i64: 32, 32>}, {pipeline_mode = #tpu.pipeline_mode<synchronous>, transform_indices = @transform_2, window_bounds = array<i64: 1, 32>}, {transform_indices = @transform_3, window_bounds = array<i64: 16, 32>}, {pipeline_mode = #tpu.pipeline_mode<synchronous>, transform_indices = @transform_4, window_bounds = array<i64: 1, 32>}, {pipeline_mode = #tpu.pipeline_mode<synchronous>, transform_indices = @transform_5, window_bounds = array<i64: 1, 32>}, {transform_indices = @transform_6, window_bounds = array<i64: 16, 32>}]} {
    %c0_i32 = arith.constant 0 : i32
    %0 = arith.cmpi eq, %arg1, %c0_i32 : i32
    %1 = arith.extui %0 : i1 to i32
    %c0_i32_0 = arith.constant 0 : i32
    %2 = arith.cmpi ne, %1, %c0_i32_0 : i32
    scf.if %2 {
      %cst_10 = arith.constant 0.000000e+00 : f32
      %12 = vector.broadcast %cst_10 : f32 to vector<16x32xf32>
      %c0_11 = arith.constant 0 : index
      %c0_12 = arith.constant 0 : index
      %13 = vector.load %arg9[%c0_11, %c0_12] : memref<16x32xf32, #tpu.memory_space<vmem>>, vector<16x32xf32>
      tpu.vector_store %arg9[%c0_11, %c0_12], %12 {strides = array<i32>} : memref<16x32xf32, #tpu.memory_space<vmem>>, vector<16x32xf32>,
    } else {
    }
    %c0 = arith.constant 0 : index
    %c0_1 = arith.constant 0 : index
    %3 = vector.load %arg9[%c0, %c0_1] : memref<16x32xf32, #tpu.memory_space<vmem>>, vector<16x32xf32>
    %c0_2 = arith.constant 0 : index
    %c0_3 = arith.constant 0 : index
    %4 = vector.load %arg2[%c0_2, %c0_3] : memref<16x32xf32, #tpu.memory_space<vmem>>, vector<16x32xf32>
    %c0_4 = arith.constant 0 : index
    %c0_5 = arith.constant 0 : index
    %5 = vector.load %arg3[%c0_4, %c0_5] : memref<32x32xf32, #tpu.memory_space<vmem>>, vector<32x32xf32>
    %cst = arith.constant dense<0.000000e+00> : vector<16x32xf32>
    %6 = tpu.matmul %4, %5, %cst {dimension_numbers = #tpu.dot_dimension_numbers<[1], [0], [0], [1], [0, 0, 1, 1], [], []>} : vector<16x32xf32>, vector<32x32xf32>, vector<16x32xf32> -> vector<16x32xf32>
    %7 = arith.addf %3, %6 : vector<16x32xf32>
    %c0_6 = arith.constant 0 : index
    %c0_7 = arith.constant 0 : index
    %8 = vector.load %arg9[%c0_6, %c0_7] : memref<16x32xf32, #tpu.memory_space<vmem>>, vector<16x32xf32>
    tpu.vector_store %arg9[%c0_6, %c0_7], %7 {strides = array<i32>} : memref<16x32xf32, #tpu.memory_space<vmem>>, vector<16x32xf32>,
    %c0_i32_8 = arith.constant 0 : i32
    %9 = arith.cmpi eq, %arg1, %c0_i32_8 : i32
    %10 = arith.extui %9 : i1 to i32
    %c0_i32_9 = arith.constant 0 : i32
    %11 = arith.cmpi ne, %10, %c0_i32_9 : i32
    scf.if %11 {
      %c0_10 = arith.constant 0 : index
      %c0_11 = arith.constant 0 : index
      %12 = vector.load %arg9[%c0_10, %c0_11] : memref<16x32xf32, #tpu.memory_space<vmem>>, vector<16x32xf32>
      %c0_12 = arith.constant 0 : index
      %c0_13 = arith.constant 0 : index
      %13 = vector.load %arg4[%c0_12, %c0_13] : memref<1x32xf32, #tpu.memory_space<vmem>>, vector<1x32xf32>
      %14 = vector.broadcast %13 : vector<1x32xf32> to vector<16x32xf32>
      %15 = arith.addf %12, %14 : vector<16x32xf32>
      %c0_14 = arith.constant 0 : index
      %c0_15 = arith.constant 0 : index
      %16 = vector.load %arg5[%c0_14, %c0_15] : memref<16x32xf32, #tpu.memory_space<vmem>>, vector<16x32xf32>
      %17 = arith.addf %15, %16 : vector<16x32xf32>
      %cst_16 = arith.constant dense<0.000000e+00> : vector<16xf32>
      %18 = vector.multi_reduction <add>, %17, %cst_16 [1] : vector<16x32xf32> to vector<16xf32>
      %19 = vector.shape_cast %18 : vector<16xf32> to vector<16x1xf32>
      %cst_17 = arith.constant 3.200000e+01 : f32
      %20 = vector.broadcast %cst_17 : f32 to vector<16x1xf32>
      %21 = arith.divf %19, %20 : vector<16x1xf32>
      %22 = vector.broadcast %21 : vector<16x1xf32> to vector<16x32xf32>
      %23 = arith.subf %17, %22 : vector<16x32xf32>
      %24 = arith.mulf %23, %23 : vector<16x32xf32>
      %cst_18 = arith.constant dense<0.000000e+00> : vector<16xf32>
      %25 = vector.multi_reduction <add>, %24, %cst_18 [1] : vector<16x32xf32> to vector<16xf32>
      %26 = vector.shape_cast %25 : vector<16xf32> to vector<16x1xf32>
      %cst_19 = arith.constant 3.200000e+01 : f32
      %27 = vector.broadcast %cst_19 : f32 to vector<16x1xf32>
      %28 = arith.divf %26, %27 : vector<16x1xf32>
      %29 = vector.broadcast %21 : vector<16x1xf32> to vector<16x32xf32>
      %30 = arith.subf %17, %29 : vector<16x32xf32>
      %cst_20 = arith.constant 9.99999996E-13 : f32
      %31 = vector.broadcast %cst_20 : f32 to vector<16x1xf32>
      %32 = arith.addf %28, %31 : vector<16x1xf32>
      %33 = math.rsqrt %32 : vector<16x1xf32>
      %34 = vector.broadcast %33 : vector<16x1xf32> to vector<16x32xf32>
      %35 = arith.mulf %30, %34 : vector<16x32xf32>
      %c0_21 = arith.constant 0 : index
      %c0_22 = arith.constant 0 : index
      %36 = vector.load %arg6[%c0_21, %c0_22] : memref<1x32xf32, #tpu.memory_space<vmem>>, vector<1x32xf32>
      %37 = vector.broadcast %36 : vector<1x32xf32> to vector<16x32xf32>
      %38 = arith.mulf %35, %37 : vector<16x32xf32>
      %c0_23 = arith.constant 0 : index
      %c0_24 = arith.constant 0 : index
      %39 = vector.load %arg7[%c0_23, %c0_24] : memref<1x32xf32, #tpu.memory_space<vmem>>, vector<1x32xf32>
      %40 = vector.broadcast %39 : vector<1x32xf32> to vector<16x32xf32>
      %41 = arith.addf %38, %40 : vector<16x32xf32>
      %c0_25 = arith.constant 0 : index
      %c0_26 = arith.constant 0 : index
      %42 = vector.load %arg8[%c0_25, %c0_26] : memref<16x32xf32, #tpu.memory_space<vmem>>, vector<16x32xf32>
      tpu.vector_store %arg8[%c0_25, %c0_26], %41 {strides = array<i32>} : memref<16x32xf32, #tpu.memory_space<vmem>>, vector<16x32xf32>,
    } else {
    }
    return
  }
  func.func @transform_0(%arg0: i32, %arg1: i32) -> (i32, i32) {
    %c0_i32 = arith.constant 0 : i32
    return %arg0, %arg1 : i32, i32
  }
  func.func @transform_1(%arg0: i32, %arg1: i32) -> (i32, i32) {
    %c0_i32 = arith.constant 0 : i32
    %c0_i32_0 = arith.constant 0 : i32
    return %arg1, %c0_i32 : i32, i32
  }
  func.func @transform_2(%arg0: i32, %arg1: i32) -> (i32, i32) {
    %c0_i32 = arith.constant 0 : i32
    %c0_i32_0 = arith.constant 0 : i32
    %c0_i32_1 = arith.constant 0 : i32
    return %c0_i32, %c0_i32_0 : i32, i32
  }
  func.func @transform_3(%arg0: i32, %arg1: i32) -> (i32, i32) {
    %c0_i32 = arith.constant 0 : i32
    %c0_i32_0 = arith.constant 0 : i32
    return %arg0, %c0_i32 : i32, i32
  }
  func.func @transform_4(%arg0: i32, %arg1: i32) -> (i32, i32) {
    %c0_i32 = arith.constant 0 : i32
    %c0_i32_0 = arith.constant 0 : i32
    %c0_i32_1 = arith.constant 0 : i32
    return %c0_i32, %c0_i32_0 : i32, i32
  }
  func.func @transform_5(%arg0: i32, %arg1: i32) -> (i32, i32) {
    %c0_i32 = arith.constant 0 : i32
    %c0_i32_0 = arith.constant 0 : i32
    %c0_i32_1 = arith.constant 0 : i32
    return %c0_i32, %c0_i32_0 : i32, i32
  }
  func.func @transform_6(%arg0: i32, %arg1: i32) -> (i32, i32) {
    %c0_i32 = arith.constant 0 : i32
    %c0_i32_0 = arith.constant 0 : i32
    return %arg0, %c0_i32 : i32, i32
  }
}

module attributes {stable_mosaic.version = 11 : i64} {
  func.func @_attention_kernel(%arg0: i32, %arg1: memref<8x96xf32, #tpu.memory_space<vmem>>, %arg2: memref<1x1x8xf32, #tpu.memory_space<vmem>>, %arg3: memref<8x32xf32, #tpu.memory_space<vmem>>) attributes {dimension_semantics = [#tpu.dimension_semantics<parallel>], iteration_bounds = array<i64: 2>, scalar_prefetch = 0 : i64, scratch_operands = 0 : i64, tpu.core_type = #tpu.core_type<tc>, window_params = [{transform_indices = @transform_0, window_bounds = array<i64: 8, 96>}, {transform_indices = @transform_1, window_bounds = array<i64: 1, 1, 8>}, {transform_indices = @transform_2, window_bounds = array<i64: 8, 32>}]} {
    %c0 = arith.constant 0 : index
    %c0_0 = arith.constant 0 : index
    %0 = vector.load %arg1[%c0, %c0_0] : memref<8x96xf32, #tpu.memory_space<vmem>>, vector<8x96xf32>
    %c0_1 = arith.constant 0 : index
    %c0_2 = arith.constant 0 : index
    %c0_3 = arith.constant 0 : index
    %1 = vector.load %arg2[%c0_1, %c0_2, %c0_3] : memref<1x1x8xf32, #tpu.memory_space<vmem>>, vector<1x1x8xf32>
    %2 = vector.shape_cast %1 : vector<1x1x8xf32> to vector<1x8xf32>
    %cst = arith.constant 0.000000e+00 : f32
    %3 = vector.broadcast %cst : f32 to vector<1x8xf32>
    %4 = arith.cmpf one, %2, %3 : vector<1x8xf32>
    %5 = vector.extract_strided_slice %0 {offsets = [0, 0], sizes = [8, 8], strides = [1, 1]} : vector<8x96xf32> to vector<8x8xf32>
    %6 = vector.extract_strided_slice %0 {offsets = [0, 32], sizes = [8, 8], strides = [1, 1]} : vector<8x96xf32> to vector<8x8xf32>
    %7 = vector.extract_strided_slice %0 {offsets = [0, 64], sizes = [8, 8], strides = [1, 1]} : vector<8x96xf32> to vector<8x8xf32>
    %cst_4 = arith.constant dense<0.000000e+00> : vector<8x8xf32>
    %8 = tpu.matmul %5, %6, %cst_4 {dimension_numbers = #tpu.dot_dimension_numbers<[1], [1], [0], [0], [0, 0, 1, 0], [], []>} : vector<8x8xf32>, vector<8x8xf32>, vector<8x8xf32> -> vector<8x8xf32>
    %cst_5 = arith.constant 0.353553385 : f32
    %9 = vector.broadcast %cst_5 : f32 to vector<8x8xf32>
    %10 = arith.mulf %8, %9 : vector<8x8xf32>
    %cst_6 = arith.constant -3.40282347E+38 : f32
    %11 = vector.shape_cast %4 : vector<1x8xi1> to vector<1x8xi1>
    %12 = vector.broadcast %11 : vector<1x8xi1> to vector<8x8xi1>
    %13 = vector.broadcast %cst_6 : f32 to vector<8x8xf32>
    %14 = arith.select %12, %10, %13 : vector<8x8xi1>, vector<8x8xf32>
    %cst_7 = arith.constant dense<0xFF800000> : vector<8xf32>
    %15 = vector.multi_reduction <maximumf>, %14, %cst_7 [1] : vector<8x8xf32> to vector<8xf32>
    %16 = vector.shape_cast %15 : vector<8xf32> to vector<8x1xf32>
    %17 = vector.broadcast %16 : vector<8x1xf32> to vector<8x8xf32>
    %18 = arith.subf %14, %17 : vector<8x8xf32>
    %19 = math.exp %18 : vector<8x8xf32>
    %cst_8 = arith.constant dense<0.000000e+00> : vector<8xf32>
    %20 = vector.multi_reduction <add>, %19, %cst_8 [1] : vector<8x8xf32> to vector<8xf32>
    %21 = vector.shape_cast %20 : vector<8xf32> to vector<8x1xf32>
    %22 = tpu.reciprocal %21 {approx = true} : vector<8x1xf32> -> vector<8x1xf32>
    %23 = vector.broadcast %22 : vector<8x1xf32> to vector<8x8xf32>
    %24 = arith.mulf %19, %23 : vector<8x8xf32>
    %cst_9 = arith.constant dense<0.000000e+00> : vector<8x8xf32>
    %25 = tpu.matmul %24, %7, %cst_9 {dimension_numbers = #tpu.dot_dimension_numbers<[1], [0], [0], [1], [0, 0, 1, 1], [], []>} : vector<8x8xf32>, vector<8x8xf32>, vector<8x8xf32> -> vector<8x8xf32>
    %26 = vector.extract_strided_slice %0 {offsets = [0, 8], sizes = [8, 8], strides = [1, 1]} : vector<8x96xf32> to vector<8x8xf32>
    %27 = vector.extract_strided_slice %0 {offsets = [0, 40], sizes = [8, 8], strides = [1, 1]} : vector<8x96xf32> to vector<8x8xf32>
    %28 = vector.extract_strided_slice %0 {offsets = [0, 72], sizes = [8, 8], strides = [1, 1]} : vector<8x96xf32> to vector<8x8xf32>
    %cst_10 = arith.constant dense<0.000000e+00> : vector<8x8xf32>
    %29 = tpu.matmul %26, %27, %cst_10 {dimension_numbers = #tpu.dot_dimension_numbers<[1], [1], [0], [0], [0, 0, 1, 0], [], []>} : vector<8x8xf32>, vector<8x8xf32>, vector<8x8xf32> -> vector<8x8xf32>
    %cst_11 = arith.constant 0.353553385 : f32
    %30 = vector.broadcast %cst_11 : f32 to vector<8x8xf32>
    %31 = arith.mulf %29, %30 : vector<8x8xf32>
    %cst_12 = arith.constant -3.40282347E+38 : f32
    %32 = vector.shape_cast %4 : vector<1x8xi1> to vector<1x8xi1>
    %33 = vector.broadcast %32 : vector<1x8xi1> to vector<8x8xi1>
    %34 = vector.broadcast %cst_12 : f32 to vector<8x8xf32>
    %35 = arith.select %33, %31, %34 : vector<8x8xi1>, vector<8x8xf32>
    %cst_13 = arith.constant dense<0xFF800000> : vector<8xf32>
    %36 = vector.multi_reduction <maximumf>, %35, %cst_13 [1] : vector<8x8xf32> to vector<8xf32>
    %37 = vector.shape_cast %36 : vector<8xf32> to vector<8x1xf32>
    %38 = vector.broadcast %37 : vector<8x1xf32> to vector<8x8xf32>
    %39 = arith.subf %35, %38 : vector<8x8xf32>
    %40 = math.exp %39 : vector<8x8xf32>
    %cst_14 = arith.constant dense<0.000000e+00> : vector<8xf32>
    %41 = vector.multi_reduction <add>, %40, %cst_14 [1] : vector<8x8xf32> to vector<8xf32>
    %42 = vector.shape_cast %41 : vector<8xf32> to vector<8x1xf32>
    %43 = tpu.reciprocal %42 {approx = true} : vector<8x1xf32> -> vector<8x1xf32>
    %44 = vector.broadcast %43 : vector<8x1xf32> to vector<8x8xf32>
    %45 = arith.mulf %40, %44 : vector<8x8xf32>
    %cst_15 = arith.constant dense<0.000000e+00> : vector<8x8xf32>
    %46 = tpu.matmul %45, %28, %cst_15 {dimension_numbers = #tpu.dot_dimension_numbers<[1], [0], [0], [1], [0, 0, 1, 1], [], []>} : vector<8x8xf32>, vector<8x8xf32>, vector<8x8xf32> -> vector<8x8xf32>
    %47 = vector.extract_strided_slice %0 {offsets = [0, 16], sizes = [8, 8], strides = [1, 1]} : vector<8x96xf32> to vector<8x8xf32>
    %48 = vector.extract_strided_slice %0 {offsets = [0, 48], sizes = [8, 8], strides = [1, 1]} : vector<8x96xf32> to vector<8x8xf32>
    %49 = vector.extract_strided_slice %0 {offsets = [0, 80], sizes = [8, 8], strides = [1, 1]} : vector<8x96xf32> to vector<8x8xf32>
    %cst_16 = arith.constant dense<0.000000e+00> : vector<8x8xf32>
    %50 = tpu.matmul %47, %48, %cst_16 {dimension_numbers = #tpu.dot_dimension_numbers<[1], [1], [0], [0], [0, 0, 1, 0], [], []>} : vector<8x8xf32>, vector<8x8xf32>, vector<8x8xf32> -> vector<8x8xf32>
    %cst_17 = arith.constant 0.353553385 : f32
    %51 = vector.broadcast %cst_17 : f32 to vector<8x8xf32>
    %52 = arith.mulf %50, %51 : vector<8x8xf32>
    %cst_18 = arith.constant -3.40282347E+38 : f32
    %53 = vector.shape_cast %4 : vector<1x8xi1> to vector<1x8xi1>
    %54 = vector.broadcast %53 : vector<1x8xi1> to vector<8x8xi1>
    %55 = vector.broadcast %cst_18 : f32 to vector<8x8xf32>
    %56 = arith.select %54, %52, %55 : vector<8x8xi1>, vector<8x8xf32>
    %cst_19 = arith.constant dense<0xFF800000> : vector<8xf32>
    %57 = vector.multi_reduction <maximumf>, %56, %cst_19 [1] : vector<8x8xf32> to vector<8xf32>
    %58 = vector.shape_cast %57 : vector<8xf32> to vector<8x1xf32>
    %59 = vector.broadcast %58 : vector<8x1xf32> to vector<8x8xf32>
    %60 = arith.subf %56, %59 : vector<8x8xf32>
    %61 = math.exp %60 : vector<8x8xf32>
    %cst_20 = arith.constant dense<0.000000e+00> : vector<8xf32>
    %62 = vector.multi_reduction <add>, %61, %cst_20 [1] : vector<8x8xf32> to vector<8xf32>
    %63 = vector.shape_cast %62 : vector<8xf32> to vector<8x1xf32>
    %64 = tpu.reciprocal %63 {approx = true} : vector<8x1xf32> -> vector<8x1xf32>
    %65 = vector.broadcast %64 : vector<8x1xf32> to vector<8x8xf32>
    %66 = arith.mulf %61, %65 : vector<8x8xf32>
    %cst_21 = arith.constant dense<0.000000e+00> : vector<8x8xf32>
    %67 = tpu.matmul %66, %49, %cst_21 {dimension_numbers = #tpu.dot_dimension_numbers<[1], [0], [0], [1], [0, 0, 1, 1], [], []>} : vector<8x8xf32>, vector<8x8xf32>, vector<8x8xf32> -> vector<8x8xf32>
    %68 = vector.extract_strided_slice %0 {offsets = [0, 24], sizes = [8, 8], strides = [1, 1]} : vector<8x96xf32> to vector<8x8xf32>
    %69 = vector.extract_strided_slice %0 {offsets = [0, 56], sizes = [8, 8], strides = [1, 1]} : vector<8x96xf32> to vector<8x8xf32>
    %70 = vector.extract_strided_slice %0 {offsets = [0, 88], sizes = [8, 8], strides = [1, 1]} : vector<8x96xf32> to vector<8x8xf32>
    %cst_22 = arith.constant dense<0.000000e+00> : vector<8x8xf32>
    %71 = tpu.matmul %68, %69, %cst_22 {dimension_numbers = #tpu.dot_dimension_numbers<[1], [1], [0], [0], [0, 0, 1, 0], [], []>} : vector<8x8xf32>, vector<8x8xf32>, vector<8x8xf32> -> vector<8x8xf32>
    %cst_23 = arith.constant 0.353553385 : f32
    %72 = vector.broadcast %cst_23 : f32 to vector<8x8xf32>
    %73 = arith.mulf %71, %72 : vector<8x8xf32>
    %cst_24 = arith.constant -3.40282347E+38 : f32
    %74 = vector.shape_cast %4 : vector<1x8xi1> to vector<1x8xi1>
    %75 = vector.broadcast %74 : vector<1x8xi1> to vector<8x8xi1>
    %76 = vector.broadcast %cst_24 : f32 to vector<8x8xf32>
    %77 = arith.select %75, %73, %76 : vector<8x8xi1>, vector<8x8xf32>
    %cst_25 = arith.constant dense<0xFF800000> : vector<8xf32>
    %78 = vector.multi_reduction <maximumf>, %77, %cst_25 [1] : vector<8x8xf32> to vector<8xf32>
    %79 = vector.shape_cast %78 : vector<8xf32> to vector<8x1xf32>
    %80 = vector.broadcast %79 : vector<8x1xf32> to vector<8x8xf32>
    %81 = arith.subf %77, %80 : vector<8x8xf32>
    %82 = math.exp %81 : vector<8x8xf32>
    %cst_26 = arith.constant dense<0.000000e+00> : vector<8xf32>
    %83 = vector.multi_reduction <add>, %82, %cst_26 [1] : vector<8x8xf32> to vector<8xf32>
    %84 = vector.shape_cast %83 : vector<8xf32> to vector<8x1xf32>
    %85 = tpu.reciprocal %84 {approx = true} : vector<8x1xf32> -> vector<8x1xf32>
    %86 = vector.broadcast %85 : vector<8x1xf32> to vector<8x8xf32>
    %87 = arith.mulf %82, %86 : vector<8x8xf32>
    %cst_27 = arith.constant dense<0.000000e+00> : vector<8x8xf32>
    %88 = tpu.matmul %87, %70, %cst_27 {dimension_numbers = #tpu.dot_dimension_numbers<[1], [0], [0], [1], [0, 0, 1, 1], [], []>} : vector<8x8xf32>, vector<8x8xf32>, vector<8x8xf32> -> vector<8x8xf32>
    %89 = tpu.concatenate %25, %46, %67, %88 in 1 : vector<8x8xf32>, vector<8x8xf32>, vector<8x8xf32>, vector<8x8xf32> -> vector<8x32xf32>
    %c0_28 = arith.constant 0 : index
    %c0_29 = arith.constant 0 : index
    %90 = vector.load %arg3[%c0_28, %c0_29] : memref<8x32xf32, #tpu.memory_space<vmem>>, vector<8x32xf32>
    tpu.vector_store %arg3[%c0_28, %c0_29], %89 {strides = array<i32>} : memref<8x32xf32, #tpu.memory_space<vmem>>, vector<8x32xf32>,
    return
  }
  func.func @transform_0(%arg0: i32) -> (i32, i32) {
    %c0_i32 = arith.constant 0 : i32
    %c0_i32_0 = arith.constant 0 : i32
    return %arg0, %c0_i32 : i32, i32
  }
  func.func @transform_1(%arg0: i32) -> (i32, i32, i32) {
    %c0_i32 = arith.constant 0 : i32
    %c0_i32_0 = arith.constant 0 : i32
    %c0_i32_1 = arith.constant 0 : i32
    return %arg0, %c0_i32, %c0_i32_0 : i32, i32, i32
  }
  func.func @transform_2(%arg0: i32) -> (i32, i32) {
    %c0_i32 = arith.constant 0 : i32
    %c0_i32_0 = arith.constant 0 : i32
    return %arg0, %c0_i32 : i32, i32
  }
}

module attributes {stable_mosaic.version = 11 : i64} {
  func.func @_dense_kernel(%arg0: i32, %arg1: i32, %arg2: i32, %arg3: memref<16x32xf32, #tpu.memory_space<vmem>>, %arg4: memref<32x64xf32, #tpu.memory_space<vmem>>, %arg5: memref<1x64xf32, #tpu.memory_space<vmem>>, %arg6: memref<16x64xf32, #tpu.memory_space<vmem>>, %arg7: memref<16x64xf32, #tpu.memory_space<vmem>>) attributes {dimension_semantics = [#tpu.dimension_semantics<parallel>, #tpu.dimension_semantics<parallel>, #tpu.dimension_semantics<arbitrary>], iteration_bounds = array<i64: 1, 1, 1>, scalar_prefetch = 0 : i64, scratch_operands = 1 : i64, tpu.core_type = #tpu.core_type<tc>, window_params = [{transform_indices = @transform_0, window_bounds = array<i64: 16, 32>}, {transform_indices = @transform_1, window_bounds = array<i64: 32, 64>}, {transform_indices = @transform_2, window_bounds = array<i64: 1, 64>}, {transform_indices = @transform_3, window_bounds = array<i64: 16, 64>}]} {
    %c0_i32 = arith.constant 0 : i32
    %0 = arith.cmpi eq, %arg2, %c0_i32 : i32
    %1 = arith.extui %0 : i1 to i32
    %c0_i32_0 = arith.constant 0 : i32
    %2 = arith.cmpi ne, %1, %c0_i32_0 : i32
    scf.if %2 {
      %cst_10 = arith.constant 0.000000e+00 : f32
      %12 = vector.broadcast %cst_10 : f32 to vector<16x64xf32>
      %c0_11 = arith.constant 0 : index
      %c0_12 = arith.constant 0 : index
      %13 = vector.load %arg7[%c0_11, %c0_12] : memref<16x64xf32, #tpu.memory_space<vmem>>, vector<16x64xf32>
      tpu.vector_store %arg7[%c0_11, %c0_12], %12 {strides = array<i32>} : memref<16x64xf32, #tpu.memory_space<vmem>>, vector<16x64xf32>,
    } else {
    }
    %c0 = arith.constant 0 : index
    %c0_1 = arith.constant 0 : index
    %3 = vector.load %arg7[%c0, %c0_1] : memref<16x64xf32, #tpu.memory_space<vmem>>, vector<16x64xf32>
    %c0_2 = arith.constant 0 : index
    %c0_3 = arith.constant 0 : index
    %4 = vector.load %arg3[%c0_2, %c0_3] : memref<16x32xf32, #tpu.memory_space<vmem>>, vector<16x32xf32>
    %c0_4 = arith.constant 0 : index
    %c0_5 = arith.constant 0 : index
    %5 = vector.load %arg4[%c0_4, %c0_5] : memref<32x64xf32, #tpu.memory_space<vmem>>, vector<32x64xf32>
    %cst = arith.constant dense<0.000000e+00> : vector<16x64xf32>
    %6 = tpu.matmul %4, %5, %cst {dimension_numbers = #tpu.dot_dimension_numbers<[1], [0], [0], [1], [0, 0, 1, 1], [], []>} : vector<16x32xf32>, vector<32x64xf32>, vector<16x64xf32> -> vector<16x64xf32>
    %7 = arith.addf %3, %6 : vector<16x64xf32>
    %c0_6 = arith.constant 0 : index
    %c0_7 = arith.constant 0 : index
    %8 = vector.load %arg7[%c0_6, %c0_7] : memref<16x64xf32, #tpu.memory_space<vmem>>, vector<16x64xf32>
    tpu.vector_store %arg7[%c0_6, %c0_7], %7 {strides = array<i32>} : memref<16x64xf32, #tpu.memory_space<vmem>>, vector<16x64xf32>,
    %c0_i32_8 = arith.constant 0 : i32
    %9 = arith.cmpi eq, %arg2, %c0_i32_8 : i32
    %10 = arith.extui %9 : i1 to i32
    %c0_i32_9 = arith.constant 0 : i32
    %11 = arith.cmpi ne, %10, %c0_i32_9 : i32
    scf.if %11 {
      %c0_10 = arith.constant 0 : index
      %c0_11 = arith.constant 0 : index
      %12 = vector.load %arg7[%c0_10, %c0_11] : memref<16x64xf32, #tpu.memory_space<vmem>>, vector<16x64xf32>
      %c0_12 = arith.constant 0 : index
      %c0_13 = arith.constant 0 : index
      %13 = vector.load %arg5[%c0_12, %c0_13] : memref<1x64xf32, #tpu.memory_space<vmem>>, vector<1x64xf32>
      %14 = vector.broadcast %13 : vector<1x64xf32> to vector<16x64xf32>
      %15 = arith.addf %12, %14 : vector<16x64xf32>
      %cst_14 = arith.constant 5.000000e-01 : f32
      %16 = vector.broadcast %cst_14 : f32 to vector<16x64xf32>
      %17 = arith.mulf %16, %15 : vector<16x64xf32>
      %cst_15 = arith.constant 0.707106769 : f32
      %18 = vector.broadcast %cst_15 : f32 to vector<16x64xf32>
      %19 = arith.mulf %15, %18 : vector<16x64xf32>
      %20 = math.erf %19 : vector<16x64xf32>
      %cst_16 = arith.constant 1.000000e+00 : f32
      %21 = vector.broadcast %cst_16 : f32 to vector<16x64xf32>
      %22 = arith.addf %21, %20 : vector<16x64xf32>
      %23 = arith.mulf %17, %22 : vector<16x64xf32>
      %c0_17 = arith.constant 0 : index
      %c0_18 = arith.constant 0 : index
      %24 = vector.load %arg6[%c0_17, %c0_18] : memref<16x64xf32, #tpu.memory_space<vmem>>, vector<16x64xf32>
      tpu.vector_store %arg6[%c0_17, %c0_18], %23 {strides = array<i32>} : memref<16x64xf32, #tpu.memory_space<vmem>>, vector<16x64xf32>,
    } else {
    }
    return
  }
  func.func @transform_0(%arg0: i32, %arg1: i32, %arg2: i32) -> (i32, i32) {
    %c0_i32 = arith.constant 0 : i32
    return %arg0, %arg2 : i32, i32
  }
  func.func @transform_1(%arg0: i32, %arg1: i32, %arg2: i32) -> (i32, i32) {
    %c0_i32 = arith.constant 0 : i32
    return %arg2, %arg1 : i32, i32
  }
  func.func @transform_2(%arg0: i32, %arg1: i32, %arg2: i32) -> (i32, i32) {
    %c0_i32 = arith.constant 0 : i32
    %c0_i32_0 = arith.constant 0 : i32
    return %c0_i32, %arg1 : i32, i32
  }
  func.func @transform_3(%arg0: i32, %arg1: i32, %arg2: i32) -> (i32, i32) {
    %c0_i32 = arith.constant 0 : i32
    return %arg0, %arg1 : i32, i32
  }
}

module attributes {stable_mosaic.version = 11 : i64} {
  func.func @_dense_res_ln_kernel(%arg0: i32, %arg1: i32, %arg2: memref<16x64xf32, #tpu.memory_space<vmem>>, %arg3: memref<64x32xf32, #tpu.memory_space<vmem>>, %arg4: memref<1x32xf32, #tpu.memory_space<vmem>>, %arg5: memref<16x32xf32, #tpu.memory_space<vmem>>, %arg6: memref<1x32xf32, #tpu.memory_space<vmem>>, %arg7: memref<1x32xf32, #tpu.memory_space<vmem>>, %arg8: memref<16x32xf32, #tpu.memory_space<vmem>>, %arg9: memref<16x32xf32, #tpu.memory_space<vmem>>) attributes {dimension_semantics = [#tpu.dimension_semantics<parallel>, #tpu.dimension_semantics<arbitrary>], iteration_bounds = array<i64: 1, 1>, scalar_prefetch = 0 : i64, scratch_operands = 1 : i64, tpu.core_type = #tpu.core_type<tc>, window_params = [{transform_indices = @transform_0, window_bounds = array<i64: 16, 64>}, {transform_indices = @transform_1, window_bounds = array<i64: 64, 32>}, {pipeline_mode = #tpu.pipeline_mode<synchronous>, transform_indices = @transform_2, window_bounds = array<i64: 1, 32>}, {transform_indices = @transform_3, window_bounds = array<i64: 16, 32>}, {pipeline_mode = #tpu.pipeline_mode<synchronous>, transform_indices = @transform_4, window_bounds = array<i64: 1, 32>}, {pipeline_mode = #tpu.pipeline_mode<synchronous>, transform_indices = @transform_5, window_bounds = array<i64: 1, 32>}, {transform_indices = @transform_6, window_bounds = array<i64: 16, 32>}]} {
    %c0_i32 = arith.constant 0 : i32
    %0 = arith.cmpi eq, %arg1, %c0_i32 : i32
    %1 = arith.extui %0 : i1 to i32
    %c0_i32_0 = arith.constant 0 : i32
    %2 = arith.cmpi ne, %1, %c0_i32_0 : i32
    scf.if %2 {
      %cst_10 = arith.constant 0.000000e+00 : f32
      %12 = vector.broadcast %cst_10 : f32 to vector<16x32xf32>
      %c0_11 = arith.constant 0 : index
      %c0_12 = arith.constant 0 : index
      %13 = vector.load %arg9[%c0_11, %c0_12] : memref<16x32xf32, #tpu.memory_space<vmem>>, vector<16x32xf32>
      tpu.vector_store %arg9[%c0_11, %c0_12], %12 {strides = array<i32>} : memref<16x32xf32, #tpu.memory_space<vmem>>, vector<16x32xf32>,
    } else {
    }
    %c0 = arith.constant 0 : index
    %c0_1 = arith.constant 0 : index
    %3 = vector.load %arg9[%c0, %c0_1] : memref<16x32xf32, #tpu.memory_space<vmem>>, vector<16x32xf32>
    %c0_2 = arith.constant 0 : index
    %c0_3 = arith.constant 0 : index
    %4 = vector.load %arg2[%c0_2, %c0_3] : memref<16x64xf32, #tpu.memory_space<vmem>>, vector<16x64xf32>
    %c0_4 = arith.constant 0 : index
    %c0_5 = arith.constant 0 : index
    %5 = vector.load %arg3[%c0_4, %c0_5] : memref<64x32xf32, #tpu.memory_space<vmem>>, vector<64x32xf32>
    %cst = arith.constant dense<0.000000e+00> : vector<16x32xf32>
    %6 = tpu.matmul %4, %5, %cst {dimension_numbers = #tpu.dot_dimension_numbers<[1], [0], [0], [1], [0, 0, 1, 1], [], []>} : vector<16x64xf32>, vector<64x32xf32>, vector<16x32xf32> -> vector<16x32xf32>
    %7 = arith.addf %3, %6 : vector<16x32xf32>
    %c0_6 = arith.constant 0 : index
    %c0_7 = arith.constant 0 : index
    %8 = vector.load %arg9[%c0_6, %c0_7] : memref<16x32xf32, #tpu.memory_space<vmem>>, vector<16x32xf32>
    tpu.vector_store %arg9[%c0_6, %c0_7], %7 {strides = array<i32>} : memref<16x32xf32, #tpu.memory_space<vmem>>, vector<16x32xf32>,
    %c0_i32_8 = arith.constant 0 : i32
    %9 = arith.cmpi eq, %arg1, %c0_i32_8 : i32
    %10 = arith.extui %9 : i1 to i32
    %c0_i32_9 = arith.constant 0 : i32
    %11 = arith.cmpi ne, %10, %c0_i32_9 : i32
    scf.if %11 {
      %c0_10 = arith.constant 0 : index
      %c0_11 = arith.constant 0 : index
      %12 = vector.load %arg9[%c0_10, %c0_11] : memref<16x32xf32, #tpu.memory_space<vmem>>, vector<16x32xf32>
      %c0_12 = arith.constant 0 : index
      %c0_13 = arith.constant 0 : index
      %13 = vector.load %arg4[%c0_12, %c0_13] : memref<1x32xf32, #tpu.memory_space<vmem>>, vector<1x32xf32>
      %14 = vector.broadcast %13 : vector<1x32xf32> to vector<16x32xf32>
      %15 = arith.addf %12, %14 : vector<16x32xf32>
      %c0_14 = arith.constant 0 : index
      %c0_15 = arith.constant 0 : index
      %16 = vector.load %arg5[%c0_14, %c0_15] : memref<16x32xf32, #tpu.memory_space<vmem>>, vector<16x32xf32>
      %17 = arith.addf %15, %16 : vector<16x32xf32>
      %cst_16 = arith.constant dense<0.000000e+00> : vector<16xf32>
      %18 = vector.multi_reduction <add>, %17, %cst_16 [1] : vector<16x32xf32> to vector<16xf32>
      %19 = vector.shape_cast %18 : vector<16xf32> to vector<16x1xf32>
      %cst_17 = arith.constant 3.200000e+01 : f32
      %20 = vector.broadcast %cst_17 : f32 to vector<16x1xf32>
      %21 = arith.divf %19, %20 : vector<16x1xf32>
      %22 = vector.broadcast %21 : vector<16x1xf32> to vector<16x32xf32>
      %23 = arith.subf %17, %22 : vector<16x32xf32>
      %24 = arith.mulf %23, %23 : vector<16x32xf32>
      %cst_18 = arith.constant dense<0.000000e+00> : vector<16xf32>
      %25 = vector.multi_reduction <add>, %24, %cst_18 [1] : vector<16x32xf32> to vector<16xf32>
      %26 = vector.shape_cast %25 : vector<16xf32> to vector<16x1xf32>
      %cst_19 = arith.constant 3.200000e+01 : f32
      %27 = vector.broadcast %cst_19 : f32 to vector<16x1xf32>
      %28 = arith.divf %26, %27 : vector<16x1xf32>
      %29 = vector.broadcast %21 : vector<16x1xf32> to vector<16x32xf32>
      %30 = arith.subf %17, %29 : vector<16x32xf32>
      %cst_20 = arith.constant 9.99999996E-13 : f32
      %31 = vector.broadcast %cst_20 : f32 to vector<16x1xf32>
      %32 = arith.addf %28, %31 : vector<16x1xf32>
      %33 = math.rsqrt %32 : vector<16x1xf32>
      %34 = vector.broadcast %33 : vector<16x1xf32> to vector<16x32xf32>
      %35 = arith.mulf %30, %34 : vector<16x32xf32>
      %c0_21 = arith.constant 0 : index
      %c0_22 = arith.constant 0 : index
      %36 = vector.load %arg6[%c0_21, %c0_22] : memref<1x32xf32, #tpu.memory_space<vmem>>, vector<1x32xf32>
      %37 = vector.broadcast %36 : vector<1x32xf32> to vector<16x32xf32>
      %38 = arith.mulf %35, %37 : vector<16x32xf32>
      %c0_23 = arith.constant 0 : index
      %c0_24 = arith.constant 0 : index
      %39 = vector.load %arg7[%c0_23, %c0_24] : memref<1x32xf32, #tpu.memory_space<vmem>>, vector<1x32xf32>
      %40 = vector.broadcast %39 : vector<1x32xf32> to vector<16x32xf32>
      %41 = arith.addf %38, %40 : vector<16x32xf32>
      %c0_25 = arith.constant 0 : index
      %c0_26 = arith.constant 0 : index
      %42 = vector.load %arg8[%c0_25, %c0_26] : memref<16x32xf32, #tpu.memory_space<vmem>>, vector<16x32xf32>
      tpu.vector_store %arg8[%c0_25, %c0_26], %41 {strides = array<i32>} : memref<16x32xf32, #tpu.memory_space<vmem>>, vector<16x32xf32>,
    } else {
    }
    return
  }
  func.func @transform_0(%arg0: i32, %arg1: i32) -> (i32, i32) {
    %c0_i32 = arith.constant 0 : i32
    return %arg0, %arg1 : i32, i32
  }
  func.func @transform_1(%arg0: i32, %arg1: i32) -> (i32, i32) {
    %c0_i32 = arith.constant 0 : i32
    %c0_i32_0 = arith.constant 0 : i32
    return %arg1, %c0_i32 : i32, i32
  }
  func.func @transform_2(%arg0: i32, %arg1: i32) -> (i32, i32) {
    %c0_i32 = arith.constant 0 : i32
    %c0_i32_0 = arith.constant 0 : i32
    %c0_i32_1 = arith.constant 0 : i32
    return %c0_i32, %c0_i32_0 : i32, i32
  }
  func.func @transform_3(%arg0: i32, %arg1: i32) -> (i32, i32) {
    %c0_i32 = arith.constant 0 : i32
    %c0_i32_0 = arith.constant 0 : i32
    return %arg0, %c0_i32 : i32, i32
  }
  func.func @transform_4(%arg0: i32, %arg1: i32) -> (i32, i32) {
    %c0_i32 = arith.constant 0 : i32
    %c0_i32_0 = arith.constant 0 : i32
    %c0_i32_1 = arith.constant 0 : i32
    return %c0_i32, %c0_i32_0 : i32, i32
  }
  func.func @transform_5(%arg0: i32, %arg1: i32) -> (i32, i32) {
    %c0_i32 = arith.constant 0 : i32
    %c0_i32_0 = arith.constant 0 : i32
    %c0_i32_1 = arith.constant 0 : i32
    return %c0_i32, %c0_i32_0 : i32, i32
  }
  func.func @transform_6(%arg0: i32, %arg1: i32) -> (i32, i32) {
    %c0_i32 = arith.constant 0 : i32
    %c0_i32_0 = arith.constant 0 : i32
    return %arg0, %c0_i32 : i32, i32
  }
}

module attributes {stable_mosaic.version = 11 : i64} {
  func.func @_dense_res_ln_kernel(%arg0: i32, %arg1: i32, %arg2: memref<16x64xf32, #tpu.memory_space<vmem>>, %arg3: memref<64x32xf32, #tpu.memory_space<vmem>>, %arg4: memref<1x32xf32, #tpu.memory_space<vmem>>, %arg5: memref<16x32xf32, #tpu.memory_space<vmem>>, %arg6: memref<1x32xf32, #tpu.memory_space<vmem>>, %arg7: memref<1x32xf32, #tpu.memory_space<vmem>>, %arg8: memref<1x32xf32, #tpu.memory_space<vmem>>, %arg9: memref<1x1xf32, #tpu.memory_space<vmem>>, %arg10: memref<16x32xf32, #tpu.memory_space<vmem>>, %arg11: memref<16x1xf32, #tpu.memory_space<vmem>>, %arg12: memref<16x32xf32, #tpu.memory_space<vmem>>) attributes {dimension_semantics = [#tpu.dimension_semantics<parallel>, #tpu.dimension_semantics<arbitrary>], iteration_bounds = array<i64: 1, 1>, scalar_prefetch = 0 : i64, scratch_operands = 1 : i64, tpu.core_type = #tpu.core_type<tc>, window_params = [{transform_indices = @transform_0, window_bounds = array<i64: 16, 64>}, {transform_indices = @transform_1, window_bounds = array<i64: 64, 32>}, {pipeline_mode = #tpu.pipeline_mode<synchronous>, transform_indices = @transform_2, window_bounds = array<i64: 1, 32>}, {transform_indices = @transform_3, window_bounds = array<i64: 16, 32>}, {pipeline_mode = #tpu.pipeline_mode<synchronous>, transform_indices = @transform_4, window_bounds = array<i64: 1, 32>}, {pipeline_mode = #tpu.pipeline_mode<synchronous>, transform_indices = @transform_5, window_bounds = array<i64: 1, 32>}, {pipeline_mode = #tpu.pipeline_mode<synchronous>, transform_indices = @transform_6, window_bounds = array<i64: 1, 32>}, {pipeline_mode = #tpu.pipeline_mode<synchronous>, transform_indices = @transform_7, window_bounds = array<i64: 1, 1>}, {transform_indices = @transform_8, window_bounds = array<i64: 16, 32>}, {transform_indices = @transform_9, window_bounds = array<i64: 16, 1>}]} {
    %c0_i32 = arith.constant 0 : i32
    %0 = arith.cmpi eq, %arg1, %c0_i32 : i32
    %1 = arith.extui %0 : i1 to i32
    %c0_i32_0 = arith.constant 0 : i32
    %2 = arith.cmpi ne, %1, %c0_i32_0 : i32
    scf.if %2 {
      %cst_10 = arith.constant 0.000000e+00 : f32
      %12 = vector.broadcast %cst_10 : f32 to vector<16x32xf32>
      %c0_11 = arith.constant 0 : index
      %c0_12 = arith.constant 0 : index
      %13 = vector.load %arg12[%c0_11, %c0_12] : memref<16x32xf32, #tpu.memory_space<vmem>>, vector<16x32xf32>
      tpu.vector_store %arg12[%c0_11, %c0_12], %12 {strides = array<i32>} : memref<16x32xf32, #tpu.memory_space<vmem>>, vector<16x32xf32>,
    } else {
    }
    %c0 = arith.constant 0 : index
    %c0_1 = arith.constant 0 : index
    %3 = vector.load %arg12[%c0, %c0_1] : memref<16x32xf32, #tpu.memory_space<vmem>>, vector<16x32xf32>
    %c0_2 = arith.constant 0 : index
    %c0_3 = arith.constant 0 : index
    %4 = vector.load %arg2[%c0_2, %c0_3] : memref<16x64xf32, #tpu.memory_space<vmem>>, vector<16x64xf32>
    %c0_4 = arith.constant 0 : index
    %c0_5 = arith.constant 0 : index
    %5 = vector.load %arg3[%c0_4, %c0_5] : memref<64x32xf32, #tpu.memory_space<vmem>>, vector<64x32xf32>
    %cst = arith.constant dense<0.000000e+00> : vector<16x32xf32>
    %6 = tpu.matmul %4, %5, %cst {dimension_numbers = #tpu.dot_dimension_numbers<[1], [0], [0], [1], [0, 0, 1, 1], [], []>} : vector<16x64xf32>, vector<64x32xf32>, vector<16x32xf32> -> vector<16x32xf32>
    %7 = arith.addf %3, %6 : vector<16x32xf32>
    %c0_6 = arith.constant 0 : index
    %c0_7 = arith.constant 0 : index
    %8 = vector.load %arg12[%c0_6, %c0_7] : memref<16x32xf32, #tpu.memory_space<vmem>>, vector<16x32xf32>
    tpu.vector_store %arg12[%c0_6, %c0_7], %7 {strides = array<i32>} : memref<16x32xf32, #tpu.memory_space<vmem>>, vector<16x32xf32>,
    %c0_i32_8 = arith.constant 0 : i32
    %9 = arith.cmpi eq, %arg1, %c0_i32_8 : i32
    %10 = arith.extui %9 : i1 to i32
    %c0_i32_9 = arith.constant 0 : i32
    %11 = arith.cmpi ne, %10, %c0_i32_9 : i32
    scf.if %11 {
      %c0_10 = arith.constant 0 : index
      %c0_11 = arith.constant 0 : index
      %12 = vector.load %arg12[%c0_10, %c0_11] : memref<16x32xf32, #tpu.memory_space<vmem>>, vector<16x32xf32>
      %c0_12 = arith.constant 0 : index
      %c0_13 = arith.constant 0 : index
      %13 = vector.load %arg4[%c0_12, %c0_13] : memref<1x32xf32, #tpu.memory_space<vmem>>, vector<1x32xf32>
      %14 = vector.broadcast %13 : vector<1x32xf32> to vector<16x32xf32>
      %15 = arith.addf %12, %14 : vector<16x32xf32>
      %c0_14 = arith.constant 0 : index
      %c0_15 = arith.constant 0 : index
      %16 = vector.load %arg5[%c0_14, %c0_15] : memref<16x32xf32, #tpu.memory_space<vmem>>, vector<16x32xf32>
      %17 = arith.addf %15, %16 : vector<16x32xf32>
      %cst_16 = arith.constant dense<0.000000e+00> : vector<16xf32>
      %18 = vector.multi_reduction <add>, %17, %cst_16 [1] : vector<16x32xf32> to vector<16xf32>
      %19 = vector.shape_cast %18 : vector<16xf32> to vector<16x1xf32>
      %cst_17 = arith.constant 3.200000e+01 : f32
      %20 = vector.broadcast %cst_17 : f32 to vector<16x1xf32>
      %21 = arith.divf %19, %20 : vector<16x1xf32>
      %22 = vector.broadcast %21 : vector<16x1xf32> to vector<16x32xf32>
      %23 = arith.subf %17, %22 : vector<16x32xf32>
      %24 = arith.mulf %23, %23 : vector<16x32xf32>
      %cst_18 = arith.constant dense<0.000000e+00> : vector<16xf32>
      %25 = vector.multi_reduction <add>, %24, %cst_18 [1] : vector<16x32xf32> to vector<16xf32>
      %26 = vector.shape_cast %25 : vector<16xf32> to vector<16x1xf32>
      %cst_19 = arith.constant 3.200000e+01 : f32
      %27 = vector.broadcast %cst_19 : f32 to vector<16x1xf32>
      %28 = arith.divf %26, %27 : vector<16x1xf32>
      %29 = vector.broadcast %21 : vector<16x1xf32> to vector<16x32xf32>
      %30 = arith.subf %17, %29 : vector<16x32xf32>
      %cst_20 = arith.constant 9.99999996E-13 : f32
      %31 = vector.broadcast %cst_20 : f32 to vector<16x1xf32>
      %32 = arith.addf %28, %31 : vector<16x1xf32>
      %33 = math.rsqrt %32 : vector<16x1xf32>
      %34 = vector.broadcast %33 : vector<16x1xf32> to vector<16x32xf32>
      %35 = arith.mulf %30, %34 : vector<16x32xf32>
      %c0_21 = arith.constant 0 : index
      %c0_22 = arith.constant 0 : index
      %36 = vector.load %arg6[%c0_21, %c0_22] : memref<1x32xf32, #tpu.memory_space<vmem>>, vector<1x32xf32>
      %37 = vector.broadcast %36 : vector<1x32xf32> to vector<16x32xf32>
      %38 = arith.mulf %35, %37 : vector<16x32xf32>
      %c0_23 = arith.constant 0 : index
      %c0_24 = arith.constant 0 : index
      %39 = vector.load %arg7[%c0_23, %c0_24] : memref<1x32xf32, #tpu.memory_space<vmem>>, vector<1x32xf32>
      %40 = vector.broadcast %39 : vector<1x32xf32> to vector<16x32xf32>
      %41 = arith.addf %38, %40 : vector<16x32xf32>
      %c0_25 = arith.constant 0 : index
      %c0_26 = arith.constant 0 : index
      %42 = vector.load %arg10[%c0_25, %c0_26] : memref<16x32xf32, #tpu.memory_space<vmem>>, vector<16x32xf32>
      tpu.vector_store %arg10[%c0_25, %c0_26], %41 {strides = array<i32>} : memref<16x32xf32, #tpu.memory_space<vmem>>, vector<16x32xf32>,
      %c0_27 = arith.constant 0 : index
      %c0_28 = arith.constant 0 : index
      %43 = vector.load %arg8[%c0_27, %c0_28] : memref<1x32xf32, #tpu.memory_space<vmem>>, vector<1x32xf32>
      %44 = vector.broadcast %43 : vector<1x32xf32> to vector<16x32xf32>
      %45 = arith.mulf %41, %44 : vector<16x32xf32>
      %cst_29 = arith.constant dense<0.000000e+00> : vector<16xf32>
      %46 = vector.multi_reduction <add>, %45, %cst_29 [1] : vector<16x32xf32> to vector<16xf32>
      %47 = vector.shape_cast %46 : vector<16xf32> to vector<16x1xf32>
      %c0_30 = arith.constant 0 : index
      %c0_31 = arith.constant 0 : index
      %48 = vector.load %arg9[%c0_30, %c0_31] : memref<1x1xf32, #tpu.memory_space<vmem>>, vector<1x1xf32>
      %49 = vector.broadcast %48 : vector<1x1xf32> to vector<16x1xf32>
      %50 = arith.addf %47, %49 : vector<16x1xf32>
      %c0_32 = arith.constant 0 : index
      %c0_33 = arith.constant 0 : index
      %51 = vector.load %arg11[%c0_32, %c0_33] : memref<16x1xf32, #tpu.memory_space<vmem>>, vector<16x1xf32>
      tpu.vector_store %arg11[%c0_32, %c0_33], %50 {strides = array<i32>} : memref<16x1xf32, #tpu.memory_space<vmem>>, vector<16x1xf32>,
    } else {
    }
    return
  }
  func.func @transform_0(%arg0: i32, %arg1: i32) -> (i32, i32) {
    %c0_i32 = arith.constant 0 : i32
    return %arg0, %arg1 : i32, i32
  }
  func.func @transform_1(%arg0: i32, %arg1: i32) -> (i32, i32) {
    %c0_i32 = arith.constant 0 : i32
    %c0_i32_0 = arith.constant 0 : i32
    return %arg1, %c0_i32 : i32, i32
  }
  func.func @transform_2(%arg0: i32, %arg1: i32) -> (i32, i32) {
    %c0_i32 = arith.constant 0 : i32
    %c0_i32_0 = arith.constant 0 : i32
    %c0_i32_1 = arith.constant 0 : i32
    return %c0_i32, %c0_i32_0 : i32, i32
  }
  func.func @transform_3(%arg0: i32, %arg1: i32) -> (i32, i32) {
    %c0_i32 = arith.constant 0 : i32
    %c0_i32_0 = arith.constant 0 : i32
    return %arg0, %c0_i32 : i32, i32
  }
  func.func @transform_4(%arg0: i32, %arg1: i32) -> (i32, i32) {
    %c0_i32 = arith.constant 0 : i32
    %c0_i32_0 = arith.constant 0 : i32
    %c0_i32_1 = arith.constant 0 : i32
    return %c0_i32, %c0_i32_0 : i32, i32
  }
  func.func @transform_5(%arg0: i32, %arg1: i32) -> (i32, i32) {
    %c0_i32 = arith.constant 0 : i32
    %c0_i32_0 = arith.constant 0 : i32
    %c0_i32_1 = arith.constant 0 : i32
    return %c0_i32, %c0_i32_0 : i32, i32
  }
  func.func @transform_6(%arg0: i32, %arg1: i32) -> (i32, i32) {
    %c0_i32 = arith.constant 0 : i32
    %c0_i32_0 = arith.constant 0 : i32
    %c0_i32_1 = arith.constant 0 : i32
    return %c0_i32, %c0_i32_0 : i32, i32
  }
  func.func @transform_7(%arg0: i32, %arg1: i32) -> (i32, i32) {
    %c0_i32 = arith.constant 0 : i32
    %c0_i32_0 = arith.constant 0 : i32
    %c0_i32_1 = arith.constant 0 : i32
    return %c0_i32, %c0_i32_0 : i32, i32
  }
  func.func @transform_8(%arg0: i32, %arg1: i32) -> (i32, i32) {
    %c0_i32 = arith.constant 0 : i32
    %c0_i32_0 = arith.constant 0 : i32
    return %arg0, %c0_i32 : i32, i32
  }
  func.func @transform_9(%arg0: i32, %arg1: i32) -> (i32, i32) {
    %c0_i32 = arith.constant 0 : i32
    %c0_i32_0 = arith.constant 0 : i32
    return %arg0, %c0_i32 : i32, i32
  }
}

</mosaic_0001>

<bundles_post_ra>
// kernel: custom_model_forward.14
= control target key start
LH: loop header
LB: loop body
LE: loop exit
PB: predicated region body
PF: predicated region fallthrough
CT: control target
= control target key end

     0   :  { %vm27_vm0 = vcmask 261120   ;;  %v173_v2 = vmov 0.0   ;;  %v174_v24 = vmov 32.0   ;;  %s261_s1 = inlined_call_operand.vmem [shape: f32[32,32], index: 1, kind: input, shape index: {}]   ;;  %s262_s0 = inlined_call_operand.vmem [shape: f32[16,32], index: 0, kind: input, shape index: {}]   ;;  %s263_s2 = inlined_call_operand.vmem [shape: f32[1,32], index: 2, kind: input, shape index: {}]   ;;  %s264_s3 = inlined_call_operand.vmem [shape: f32[16,32], index: 3, kind: input, shape index: {}]   ;;  %s265_s4 = inlined_call_operand.vmem [shape: f32[1,32], index: 4, kind: input, shape index: {}]   ;;  %s266_s5 = inlined_call_operand.vmem [shape: f32[1,32], index: 5, kind: input, shape index: {}]   ;;  %s267_s6 = inlined_call_operand.vmem [shape: f32[16,32], index: 6, kind: output, shape index: {}]  }
   0x1   :  { %v37_v0 = vld [vmem:[%s261_s1 + $0x18] sm:$0xff]  ;;  %v36_v1 = vld [vmem:[%s261_s1 + $0x10] sm:$0xff]  ;;  %28 = vst.msk [vmem:[#allocation2] sm:$0xff] %vm27_vm0, %v173_v2  ;;  %v35_v3 = vld [vmem:[%s261_s1 + $0x8] sm:$0xff]  ;;  %167 = vrcp.f32 %v174_v24 }
   0x2   :  { %57 = vmatpush.msra.mxu0 %v37_v0  ;;  %158 = vmatpush.msra.mxu1 %v37_v0  ;;  %29 = vst.msk [vmem:[#allocation2 + $0x8] sm:$0xff] %vm27_vm0, %v173_v2  ;;  %v34_v4 = vld [vmem:[%s261_s1] sm:$0xff]  ;;  %v33_v6 = vld [vmem:[%s262_s0 + $0x8] sm:$0xff] }
   0x3   :  { %v32_v5 = vld [vmem:[%s262_s0] sm:$0xff]  ;;  %v84_v20 = vld [vmem:[%s264_s3 + $0x8] sm:$0xff] }
   0x4   :  { %58 = vmatpush.msra.mxu0 %v36_v1  ;;  %159 = vmatpush.msra.mxu1 %v36_v1  ;;  %v164_v13 = vld [vmem:[%s263_s2] ss:$0 sm:$0xff] }
   0x5   :  { %v83_v15 = vld [vmem:[%s264_s3] sm:$0xff] }
   0x6   :  { %59 = vmatpush.msra.mxu0 %v35_v3  ;;  %160 = vmatpush.msra.mxu1 %v35_v3  ;;  %v165_v55 = vld [vmem:[%s265_s4] ss:$0 sm:$0xff] }
   0x7   :  { %v168_v25 = vpop.eup %167  ;;  %v166_v58 = vld [vmem:[%s266_s5] ss:$0 sm:$0xff] }
   0x8   :  { %60 = vmatpush.msra.mxu0 %v34_v4  ;;  %161 = vmatpush.msra.mxu1 %v34_v4  ;;  %v30_v7 = vld [vmem:[#allocation2] sm:$0xff]  ;;  %v94_v26 = vmul.f32 32.0, %v168_v25  ;;  %vm98_vm1 = vweird.f32 %v168_v25 }
   0x9   :  { %156 = vmatmul.msk.f32.vlgmr.msra.gmra.mxu0 %vm27_vm0, %v32_v5  ;;  %157 = vmatmul.msk.f32.vlgmr.msra.gmra.mxu1 %vm27_vm0, %v33_v6  ;;  %v31_v8 = vld [vmem:[#allocation2 + $0x8] sm:$0xff] }
   0xa   :  { %v95_v27 = vsub.f32 1.0, %v94_v26 }
   0xc   :  { %v96_v28 = vmul.f32 %v168_v25, %v95_v27 }
   0xe   :  { %v97_v29 = vadd.f32 %v168_v25, %v96_v28 }
  0x10   :  { %v99_v30 = vsel %vm98_vm1, %v168_v25, %v97_v29 }
  0x86   :  { %v62_v9 = vpop.f32.mrf.mxu0  ;;  %v65_v10 = vpop.f32.mrf.mxu1 }
  0x87   :  { %v68_v11 = vadd.f32 %v62_v9, %v30_v7  ;;  %v69_v12 = vadd.f32 %v65_v10, %v31_v8 }
  0x89   :  { %70 = vst.msk [vmem:[#allocation2] sm:$0xff] %vm27_vm0, %v68_v11 }
  0x8a   :  { %71 = vst.msk [vmem:[#allocation2 + $0x8] sm:$0xff] %vm27_vm0, %v69_v12 }
  0x90   :  { %v75_v14 = vld [vmem:[#allocation2] sm:$0xff] }
  0x91   :  { %v81_v16 = vadd.f32 %v164_v13, %v75_v14  ;;  %v76_v17 = vld [vmem:[#allocation2 + $0x8] sm:$0xff] }
  0x92   :  { %v82_v19 = vadd.f32 %v164_v13, %v76_v17 }
  0x93   :  { %v85_v18 = vadd.f32 %v83_v15, %v81_v16 }
  0x94   :  { %v86_v22 = vadd.f32 %v84_v20, %v82_v19 }
  0x95   :  { %v87_v21 = vsel %vm27_vm0, %v85_v18, 0.0 }
  0x96   :  { %88 = vadd.xlane.f32.xlu0 %v87_v21  ;;  %v90_v23 = vsel %vm27_vm0, %v86_v22, 0.0 }
  0x9e   :  { %91 = vadd.xlane.f32.xlu0 %v90_v23 }
 0x109   :  { %v89_v31 = vpop.xlane.xlu0 %88 }
 0x10a   :  { %v100_v32 = vmul.f32 %v99_v30, %v89_v31 }
 0x10c   :  { %v102_v33 = vsub.f32 %v85_v18, %v100_v32 }
 0x10e   :  { %v104_v34 = vmul.f32 %v102_v33, %v102_v33 }
 0x110   :  { %v106_v35 = vsel %vm27_vm0, %v104_v34, 0.0 }
 0x111   :  { %107 = vadd.xlane.f32.xlu1 %v106_v35  ;;  %v92_v36 = vpop.xlane.xlu0 %91 }
 0x112   :  { %v101_v37 = vmul.f32 %v99_v30, %v92_v36 }
 0x114   :  { %v103_v38 = vsub.f32 %v86_v22, %v101_v37 }
 0x116   :  { %v105_v39 = vmul.f32 %v103_v38, %v103_v38 }
 0x118   :  { %v109_v40 = vsel %vm27_vm0, %v105_v39, 0.0 }
 0x119   :  { %110 = vadd.xlane.f32.xlu1 %v109_v40 }
 0x184   :  { %v108_v41 = vpop.xlane.xlu1 %107 }
 0x185   :  { %v112_v42 = vmul.f32 %v108_v41, %v99_v30 }
 0x187   :  { %v114_v43 = vadd.f32 1e-12, %v112_v42 }
 0x189   :  { %169 = vrsqrt.f32 %v114_v43  ;;  %vm122_vm3 = vweird.f32 %v114_v43 }
 0x18c   :  { %v111_v44 = vpop.xlane.xlu1 %110 }
 0x18d   :  { %v113_v45 = vmul.f32 %v111_v44, %v99_v30 }
 0x18f   :  { %v170_v46 = vpop.eup %169  ;;  %v115_v47 = vadd.f32 1e-12, %v113_v45 }
 0x190   :  { %v117_v48 = vmul.f32 %v170_v46, %v114_v43  ;;  %vm123_vm2 = vweird.f32 %v170_v46 }
 0x191   :  { %171 = vrsqrt.f32 %v115_v47  ;;  %vm124_vm4 = vmor %vm122_vm3, %vm123_vm2  ;;  %vm132_vm6 = vweird.f32 %v115_v47 }
 0x192   :  { %v118_v49 = vmul.f32 %v170_v46, %v117_v48 }
 0x194   :  { %v119_v50 = vmul.f32 0.5, %v118_v49 }
 0x196   :  { %v120_v51 = vsub.f32 1.5, %v119_v50 }
 0x197   :  { %v172_v52 = vpop.eup %171 }
 0x198   :  { %v121_v53 = vmul.f32 %v170_v46, %v120_v51  ;;  %v127_v54 = vmul.f32 %v172_v52, %v115_v47  ;;  %vm133_vm5 = vweird.f32 %v172_v52 }
 0x199   :  { %vm134_vm7 = vmor %vm132_vm6, %vm133_vm5 }
 0x19a   :  { %v125_v56 = vsel %vm124_vm4, %v170_v46, %v121_v53  ;;  %v128_v57 = vmul.f32 %v172_v52, %v127_v54 }
 0x19b   :  { %v136_v59 = vmul.f32 %v125_v56, %v102_v33 }
 0x19c   :  { %v129_v60 = vmul.f32 0.5, %v128_v57 }
 0x19d   :  { %v142_v61 = vmul.f32 %v165_v55, %v136_v59 }
 0x19e   :  { %v130_v62 = vsub.f32 1.5, %v129_v60 }
 0x19f   :  { %v148_v63 = vadd.f32 %v166_v58, %v142_v61 }
 0x1a0   :  { %v131_v0 = vmul.f32 %v172_v52, %v130_v62 }
 0x1a1   :  { %150 = vst.msk [vmem:[%s267_s6] sm:$0xff] %vm27_vm0, %v148_v63 }
 0x1a2   :  { %v135_v1 = vsel %vm134_vm7, %v172_v52, %v131_v0 }
 0x1a3   :  { %v137_v2 = vmul.f32 %v135_v1, %v103_v38 }
 0x1a5   :  { %v143_v3 = vmul.f32 %v165_v55, %v137_v2 }
 0x1a7   :  { %v149_v4 = vadd.f32 %v166_v58, %v143_v3 }
 0x1a9   :  { %151 = vst.msk [vmem:[%s267_s6 + $0x8] sm:$0xff] %vm27_vm0, %v149_v4 }

// kernel: custom_model_forward.12
= control target key start
LH: loop header
LB: loop body
LE: loop exit
PB: predicated region body
PF: predicated region fallthrough
CT: control target
= control target key end

     0   :  { %vm18_vm0 = vcmask 785408   ;;  %v89_v2 = vmov 0.0   ;;  %vm29_vm1 = vcmask 261120   ;;  %s143_s1 = inlined_call_operand.vmem [shape: f32[32,96], index: 1, kind: input, shape index: {}]   ;;  %s144_s2 = inlined_call_operand.vmem [shape: f32[1,96], index: 2, kind: input, shape index: {}]   ;;  %s145_s0 = inlined_call_operand.vmem [shape: f32[16,32], index: 0, kind: input, shape index: {}]   ;;  %s146_s3 = inlined_call_operand.vmem [shape: f32[16,96], index: 3, kind: output, shape index: {}]  }
   0x1   :  { %v28_v0 = vld [vmem:[%s143_s1 + $0x18] sm:$0xff]  ;;  %v27_v1 = vld [vmem:[%s143_s1 + $0x10] sm:$0xff]  ;;  %19 = vst.msk [vmem:[#allocation2] sm:$0xff] %vm18_vm0, %v89_v2  ;;  %v26_v3 = vld [vmem:[%s143_s1 + $0x8] sm:$0xff] }
   0x2   :  { %48 = vmatpush.msra.mxu0 %v28_v0  ;;  %83 = vmatpush.msra.mxu1 %v28_v0  ;;  %20 = vst.msk [vmem:[#allocation2 + $0x8] sm:$0xff] %vm18_vm0, %v89_v2  ;;  %v25_v4 = vld [vmem:[%s143_s1] sm:$0xff]  ;;  %v24_v6 = vld [vmem:[%s145_s0 + $0x8] sm:$0xff] }
   0x3   :  { %v23_v5 = vld [vmem:[%s145_s0] sm:$0xff] }
   0x4   :  { %49 = vmatpush.msra.mxu0 %v27_v1  ;;  %84 = vmatpush.msra.mxu1 %v27_v1  ;;  %v88_v13 = vld [vmem:[%s144_s2] ss:$0 sm:$0xff] }
   0x6   :  { %50 = vmatpush.msra.mxu0 %v26_v3  ;;  %85 = vmatpush.msra.mxu1 %v26_v3 }
   0x8   :  { %51 = vmatpush.msra.mxu0 %v25_v4  ;;  %86 = vmatpush.msra.mxu1 %v25_v4  ;;  %v21_v7 = vld [vmem:[#allocation2] sm:$0xff] }
   0x9   :  { %81 = vmatmul.msk.f32.vlgmr.msra.gmra.mxu0 %vm29_vm1, %v23_v5  ;;  %82 = vmatmul.msk.f32.vlgmr.msra.gmra.mxu1 %vm29_vm1, %v24_v6  ;;  %v22_v8 = vld [vmem:[#allocation2 + $0x8] sm:$0xff] }
  0x86   :  { %v53_v9 = vpop.f32.mrf.mxu0  ;;  %v56_v10 = vpop.f32.mrf.mxu1 }
  0x87   :  { %v59_v11 = vadd.f32 %v53_v9, %v21_v7  ;;  %v60_v12 = vadd.f32 %v56_v10, %v22_v8 }
  0x89   :  { %62 = vst.msk [vmem:[#allocation2] sm:$0xff] %vm18_vm0, %v59_v11 }
  0x8a   :  { %63 = vst.msk [vmem:[#allocation2 + $0x8] sm:$0xff] %vm18_vm0, %v60_v12 }
  0x90   :  { %v67_v14 = vld [vmem:[#allocation2] sm:$0xff] }
  0x91   :  { %v73_v15 = vadd.f32 %v88_v13, %v67_v14  ;;  %v68_v16 = vld [vmem:[#allocation2 + $0x8] sm:$0xff] }
  0x92   :  { %v74_v17 = vadd.f32 %v88_v13, %v68_v16 }
  0x93   :  { %75 = vst.msk [vmem:[%s146_s3] sm:$0xff] %vm18_vm0, %v73_v15 }
  0x94   :  { %76 = vst.msk [vmem:[%s146_s3 + $0x8] sm:$0xff] %vm18_vm0, %v74_v17 }

// kernel: custom_model_forward.11
= control target key start
LH: loop header
LB: loop body
LE: loop exit
PB: predicated region body
PF: predicated region fallthrough
CT: control target
= control target key end

     0   :  { %vm16_vm0 = vcmask 261120   ;;  %v95_v4 = vmov 32.0   ;;  %s140_s0 = inlined_call_operand.vmem [shape: f32[16,32], index: 0, kind: input, shape index: {}]   ;;  %s141_s1 = inlined_call_operand.vmem [shape: f32[1,32], index: 1, kind: input, shape index: {}]   ;;  %s142_s2 = inlined_call_operand.vmem [shape: f32[1,32], index: 2, kind: input, shape index: {}]   ;;  %s143_s3 = inlined_call_operand.vmem [shape: f32[16,32], index: 3, kind: output, shape index: {}]  }
   0x1   :  { %v14_v0 = vld [vmem:[%s140_s0] sm:$0xff]  ;;  %v15_v2 = vld [vmem:[%s140_s0 + $0x8] sm:$0xff]  ;;  %89 = vrcp.f32 %v95_v4 }
   0x2   :  { %v17_v1 = vsel %vm16_vm0, %v14_v0, 0.0  ;;  %v20_v3 = vsel %vm16_vm0, %v15_v2, 0.0  ;;  %v87_v35 = vld [vmem:[%s141_s1] ss:$0 sm:$0xff] }
   0x3   :  { %18 = vadd.xlane.f32.xlu0 %v17_v1  ;;  %v88_v38 = vld [vmem:[%s142_s2] ss:$0 sm:$0xff] }
   0x7   :  { %v90_v5 = vpop.eup %89 }
   0x8   :  { %v24_v6 = vmul.f32 32.0, %v90_v5  ;;  %vm28_vm1 = vweird.f32 %v90_v5 }
   0xa   :  { %v25_v7 = vsub.f32 1.0, %v24_v6 }
   0xb   :  { %21 = vadd.xlane.f32.xlu0 %v20_v3 }
   0xc   :  { %v26_v8 = vmul.f32 %v90_v5, %v25_v7 }
   0xe   :  { %v27_v9 = vadd.f32 %v90_v5, %v26_v8 }
  0x10   :  { %v29_v10 = vsel %vm28_vm1, %v90_v5, %v27_v9 }
  0x76   :  { %v19_v11 = vpop.xlane.xlu0 %18 }
  0x77   :  { %v30_v12 = vmul.f32 %v29_v10, %v19_v11 }
  0x79   :  { %v32_v13 = vsub.f32 %v14_v0, %v30_v12 }
  0x7b   :  { %v34_v14 = vmul.f32 %v32_v13, %v32_v13 }
  0x7d   :  { %v36_v15 = vsel %vm16_vm0, %v34_v14, 0.0 }
  0x7e   :  { %37 = vadd.xlane.f32.xlu1 %v36_v15  ;;  %v22_v16 = vpop.xlane.xlu0 %21 }
  0x7f   :  { %v31_v17 = vmul.f32 %v29_v10, %v22_v16 }
  0x81   :  { %v33_v18 = vsub.f32 %v15_v2, %v31_v17 }
  0x83   :  { %v35_v19 = vmul.f32 %v33_v18, %v33_v18 }
  0x85   :  { %v39_v20 = vsel %vm16_vm0, %v35_v19, 0.0 }
  0x86   :  { %40 = vadd.xlane.f32.xlu1 %v39_v20 }
  0xf1   :  { %v38_v21 = vpop.xlane.xlu1 %37 }
  0xf2   :  { %v42_v22 = vmul.f32 %v38_v21, %v29_v10 }
  0xf4   :  { %v44_v23 = vadd.f32 1e-12, %v42_v22 }
  0xf6   :  { %91 = vrsqrt.f32 %v44_v23  ;;  %vm52_vm3 = vweird.f32 %v44_v23 }
  0xf9   :  { %v41_v24 = vpop.xlane.xlu1 %40 }
  0xfa   :  { %v43_v25 = vmul.f32 %v41_v24, %v29_v10 }
  0xfc   :  { %v92_v26 = vpop.eup %91  ;;  %v45_v27 = vadd.f32 1e-12, %v43_v25 }
  0xfd   :  { %v47_v28 = vmul.f32 %v92_v26, %v44_v23  ;;  %vm53_vm2 = vweird.f32 %v92_v26 }
  0xfe   :  { %93 = vrsqrt.f32 %v45_v27  ;;  %vm54_vm4 = vmor %vm52_vm3, %vm53_vm2  ;;  %vm62_vm6 = vweird.f32 %v45_v27 }
  0xff   :  { %v48_v29 = vmul.f32 %v92_v26, %v47_v28 }
 0x101   :  { %v49_v30 = vmul.f32 0.5, %v48_v29 }
 0x103   :  { %v50_v31 = vsub.f32 1.5, %v49_v30 }
 0x104   :  { %v94_v32 = vpop.eup %93 }
 0x105   :  { %v51_v33 = vmul.f32 %v92_v26, %v50_v31  ;;  %v57_v34 = vmul.f32 %v94_v32, %v45_v27  ;;  %vm63_vm5 = vweird.f32 %v94_v32 }
 0x106   :  { %vm64_vm7 = vmor %vm62_vm6, %vm63_vm5 }
 0x107   :  { %v55_v36 = vsel %vm54_vm4, %v92_v26, %v51_v33  ;;  %v58_v37 = vmul.f32 %v94_v32, %v57_v34 }
 0x108   :  { %v66_v39 = vmul.f32 %v55_v36, %v32_v13 }
 0x109   :  { %v59_v40 = vmul.f32 0.5, %v58_v37 }
 0x10a   :  { %v72_v41 = vmul.f32 %v87_v35, %v66_v39 }
 0x10b   :  { %v60_v42 = vsub.f32 1.5, %v59_v40 }
 0x10c   :  { %v78_v43 = vadd.f32 %v88_v38, %v72_v41 }
 0x10d   :  { %v61_v44 = vmul.f32 %v94_v32, %v60_v42 }
 0x10e   :  { %80 = vst.msk [vmem:[%s143_s3] sm:$0xff] %vm16_vm0, %v78_v43 }
 0x10f   :  { %v65_v45 = vsel %vm64_vm7, %v94_v32, %v61_v44 }
 0x110   :  { %v67_v46 = vmul.f32 %v65_v45, %v33_v18 }
 0x112   :  { %v73_v47 = vmul.f32 %v87_v35, %v67_v46 }
 0x114   :  { %v79_v48 = vadd.f32 %v88_v38, %v73_v47 }
 0x116   :  { %81 = vst.msk [vmem:[%s143_s3 + $0x8] sm:$0xff] %vm16_vm0, %v79_v48 }

// kernel: custom_model_forward.13
= control target key start
LH: loop header
LB: loop body
LE: loop exit
PB: predicated region body
PF: predicated region fallthrough
CT: control target
= control target key end

     0   :  { %s606_s9 = smov 0   ;;  %s684_s0 = inlined_call_operand.vmem [shape: f32[16,96], index: 0, kind: input, shape index: {}]   ;;  %s685_s1 = inlined_call_operand.vmem [shape: f32[2,1,8], index: 1, kind: input, shape index: {}]   ;;  %s686_s2 = inlined_call_operand.vmem [shape: f32[16,32], index: 2, kind: output, shape index: {}]  }
   0x1 LB: > { %s508_s10 = sadd.s32 4294967295, %s574_s9   ;;  %p512_p0 = scmp.ge.s32.totalorder %s574_s9, 1  ;;  %s574_s9 = sphi %s606_s9, %s12_s9  }
   0x2   : > { %p119_p1 = scmp.lt.s32.totalorder %s574_s9, 3 }
   0x4   : > { %p120_p2 = pnand %p512_p0, %p119_p1 }
   0x5   : > { %p142_p3 = scmp.lt.s32.totalorder (!%p120_p2), %s508_s10, 1  ;;  %s576_s15 = smov (!%p120_p2), 96  }
   0x6   : > { %123 = sbr.rel (%p120_p2) target bundleno = 1176 (0x498), region = 28  ;;  %s577_s16 = smov (!%p120_p2), 88  }
   0x7   : > { %s578_s17 = smov (!%p120_p2), 120   ;;  %s580_s21 = smov (!%p120_p2), 64  }
   0x8   : > { %s581_s22 = smov (!%p120_p2), 80   ;;  %s582_s23 = smov (!%p120_p2), 72  }
   0x9   : > { %s583_s24 = smov (!%p120_p2), 112   ;;  %s584_s25 = smov (!%p120_p2), 104  }
   0xa   : > { %s585_s26 = smov (!%p120_p2), 48   ;;  %s586_s27 = smov (!%p120_p2), 56  }
   0xb   : > { %s690_s10 = smov (!%p142_p3, %s508_s10), 1  ;;  %vm159_vm0 = vcmask 64512   ;;  %v579_v5 = vmov 0   ;;  %s587_s28 = smov 40   ;;  %vm440_vm3 = vcmask 130048   ;;  %vm442_vm4 = vcmask 195584  }
   0xc   : > { %s513_s11 = sshll.u32 %s690_s10, 3  ;;  %s148_s20 = scalar_lea.vmem %s685_s1, %s690_s10  ;;  %vm444_vm5 = vcmask 261120  }
   0xd   : > { %s145_s14 = scalar_lea.vmem %s684_s0, %s513_s11  ;;  %v154_v4 = vld [vmem:[%s148_s20] sm:$0x1]  ;;  %s588_s29 = smov 24  }
   0xe   : > { %v622_v0 = vld [vmem:[%s145_s14] sm:$0xff]  ;;  %vm155_vm1 = vcmp.ne.f32.partialorder %v154_v4, 0.0  ;;  %s589_s30 = smov 8   ;;  %s590_s3 = smov 16  }
   0xf   : > { %157 = vrot.lane.b32.xlu0 %v622_v0, %s576_s15  ;;  %228 = vrot.lane.b32.xlu1 %v622_v0, %s577_s16  ;;  %v185_v6 = vsel %vm155_vm1, 1, %v579_v5  ;;  %s152_s6 = scalar_lea.vmem %s686_s2, %s513_s11 }
  0x10   : > { %226 = vrot.lane.b32.xlu2 %v622_v0, %s578_s17  ;;  %v186_v7 = vperm.slane %v185_v6, 0 }
  0x12   : > { %vm636_vm2 = vcmp.eq.s32.totalorder %v186_v7, 1 }
  0x18   : > { %200 = vrot.lane.b32.xlu2 %v622_v0, %s580_s21 }
  0x20   : > { %295 = vrot.lane.b32.xlu2 %v622_v0, %s581_s22 }
  0x28   : > { %362 = vrot.lane.b32.xlu2 %v622_v0, %s582_s23 }
  0x30   : > { %293 = vrot.lane.b32.xlu2 %v622_v0, %s583_s24 }
  0x6a   : > { %v227_v3 = vpop.permute.xlu2 %226 }
  0x72   : > { %v201_v16 = vpop.permute.xlu2 %200 }
  0x73   : > { %221 = vmatpush.msra.mxu1 %v201_v16 }
  0x7a   : > { %v296_v21 = vpop.permute.xlu2 %295 }
  0x7b   : > { %521 = vmatpush.xpose.msk.msrb.mxu1 %vm159_vm0, %v296_v21 }
  0x81   : > { %v158_v1 = vpop.permute.xlu0 %157  ;;  %v229_v2 = vpop.permute.xlu1 %228 }
  0x82   : > { %515 = vmatpush.xpose.msk.msra.mxu0 %vm159_vm0, %v158_v1  ;;  %518 = vmatpush.xpose.msk.msra.mxu2 %vm159_vm0, %v229_v2  ;;  %v363_v24 = vpop.permute.xlu2 %362 }
  0x85   : > { %516 = vmatmul.msk.f32.vlgmr.msra.gmra.mxu0 %vm159_vm0, %v622_v0  ;;  %519 = vmatmul.msk.f32.vlgmr.msra.gmra.mxu2 %vm159_vm0, %v227_v3 }
  0x86   : > { %524 = vmatpush.xpose.msk.msrb.mxu0 %vm159_vm0, %v363_v24 }
  0x8a   : > { %v294_v28 = vpop.permute.xlu2 %293 }
 0x102   : > { %v181_v8 = vpop.f32.mrf.mxu0 }
 0x103   : > { %v184_v10 = vmul.f32 0.35355338, %v181_v8 }
 0x105   : > { %v188_v11 = vsel %vm636_vm2, %v184_v10, -3.4028235e+38 }
 0x106   : > { %v189_v12 = vsel %vm159_vm0, %v188_v11, -inf }
 0x107   : > { %190 = vmax.xlane.f32.xlu0 %v189_v12 }
 0x108   : > { %v251_v19 = vpop.f32.mrf.mxu2 }
 0x109   : > { %v254_v20 = vmul.f32 0.35355338, %v251_v19 }
 0x10b   : > { %v255_v22 = vsel %vm636_vm2, %v254_v20, -3.4028235e+38 }
 0x10c   : > { %v256_v23 = vsel %vm159_vm0, %v255_v22, -inf }
 0x10d   : > { %257 = vmax.xlane.f32.xlu2 %v256_v23 }
 0x17a   : > { %v191_v13 = vpop.xlane.xlu0 %190 }
 0x17b   : > { %v192_v14 = vsub.f32 %v188_v11, %v191_v13 }
 0x17d   : > { %v193_v15 = vmul.f32 1.442695, %v192_v14 }
 0x17f   : > { %552 = vpow2.f32 %v193_v15 }
 0x180   : > { %v258_v31 = vpop.xlane.xlu2 %257 }
 0x181   : > { %v259_v34 = vsub.f32 %v255_v22, %v258_v31 }
 0x183   : > { %v260_v37 = vmul.f32 1.442695, %v259_v34 }
 0x185   : > { %v553_v17 = vpop.eup %552 }
 0x186   : > { %v195_v18 = vsel %vm159_vm0, %v553_v17, 0.0 }
 0x187   : > { %196 = vadd.xlane.f32.xlu1 %v195_v18 }
 0x1a0   : > { %360 = vrot.lane.b32.xlu1 %v622_v0, %s584_s25 }
 0x1fa   : > { %v197_v25 = vpop.xlane.xlu1 %196 }
 0x1fb   : > { %554 = vrcp.f32 %v197_v25 }
 0x1fc   : > { %556 = vpow2.f32 %v260_v37 }
 0x201   : > { %v555_v26 = vpop.eup %554 }
 0x202   : > { %v199_v27 = vmul.f32 %v555_v26, %v553_v17  ;;  %v557_v42 = vpop.eup %556 }
 0x203   : > { %v262_v43 = vsel %vm159_vm0, %v557_v42, 0.0 }
 0x204   : > { %517 = vmatmul.msk.f32.vlgmr.msra.gmra.mxu1 %vm159_vm0, %v199_v27 }
 0x20c   : > { %522 = vmatmul.msk.f32.vlgmr.msrb.gmra.mxu1 %vm159_vm0, %v294_v28 }
 0x212   : > { %v361_v29 = vpop.permute.xlu1 %360 }
 0x213   : > { %525 = vmatmul.msk.f32.vlgmr.msrb.gmra.mxu0 %vm159_vm0, %v361_v29 }
 0x281   : > { %v657_v30 = vpop.f32.mrf.mxu1 }
 0x289   : > { %v318_v32 = vpop.f32.mrf.mxu1 }
 0x28a   : > { %v321_v33 = vmul.f32 0.35355338, %v318_v32 }
 0x28c   : > { %v322_v35 = vsel %vm636_vm2, %v321_v33, -3.4028235e+38 }
 0x28d   : > { %v323_v36 = vsel %vm159_vm0, %v322_v35, -inf }
 0x28e   : > { %324 = vmax.xlane.f32.xlu1 %v323_v36 }
 0x290   : > { %v385_v38 = vpop.f32.mrf.mxu0 }
 0x291   : > { %v388_v39 = vmul.f32 0.35355338, %v385_v38 }
 0x293   : > { %v389_v40 = vsel %vm636_vm2, %v388_v39, -3.4028235e+38 }
 0x294   : > { %v390_v41 = vsel %vm159_vm0, %v389_v40, -inf }
 0x295   : > { %391 = vmax.xlane.f32.xlu0 %v390_v41 }
 0x29d   : > { %263 = vadd.xlane.f32.xlu0 %v262_v43 }
 0x2a7   : > { %334 = vrot.lane.b32.xlu1 %v622_v0, %s585_s26 }
 0x301   : > { %v325_v44 = vpop.xlane.xlu1 %324 }
 0x302   : > { %v326_v45 = vsub.f32 %v322_v35, %v325_v44 }
 0x304   : > { %v327_v46 = vmul.f32 1.442695, %v326_v45 }
 0x306   : > { %558 = vpow2.f32 %v327_v46 }
 0x308   : > { %v392_v47 = vpop.xlane.xlu0 %391 }
 0x309   : > { %v393_v48 = vsub.f32 %v389_v40, %v392_v47 }
 0x30b   : > { %v394_v49 = vmul.f32 1.442695, %v393_v48 }
 0x30c   : > { %v559_v50 = vpop.eup %558 }
 0x30d   : > { %560 = vpow2.f32 %v394_v49  ;;  %v329_v51 = vsel %vm159_vm0, %v559_v50, 0.0 }
 0x30e   : > { %330 = vadd.xlane.f32.xlu0 %v329_v51 }
 0x310   : > { %v264_v54 = vpop.xlane.xlu0 %263 }
 0x313   : > { %v561_v52 = vpop.eup %560 }
 0x314   : > { %v396_v53 = vsel %vm159_vm0, %v561_v52, 0.0 }
 0x315   : > { %397 = vadd.xlane.f32.xlu2 %v396_v53 }
 0x319   : > { %v335_v62 = vpop.permute.xlu1 %334 }
 0x322   : > { %267 = vrot.lane.b32.xlu0 %v622_v0, %s586_s27 }
 0x32d   : > { %401 = vrot.lane.b32.xlu2 %v622_v0, %s587_s28 }
 0x381   : > { %v331_v56 = vpop.xlane.xlu0 %330 }
 0x388   : > { %v398_v55 = vpop.xlane.xlu2 %397 }
 0x389   : > { %562 = vrcp.f32 %v398_v55 }
 0x38a   : > { %564 = vrcp.f32 %v264_v54 }
 0x38b   : > { %566 = vrcp.f32 %v331_v56 }
 0x38f   : > { %v563_v57 = vpop.eup %562 }
 0x390   : > { %v402_v58 = vpop.permute.xlu2 %401  ;;  %v400_v59 = vmul.f32 %v563_v57, %v561_v52  ;;  %v565_v60 = vpop.eup %564 }
 0x391   : > { %422 = vmatpush.msrb.mxu2 %v402_v58  ;;  %v266_v63 = vmul.f32 %v565_v60, %v557_v42  ;;  %v567_v0 = vpop.eup %566 }
 0x392   : > { %526 = vmatmul.msk.f32.vlgmr.msrb.gmra.mxu2 %vm159_vm0, %v400_v59  ;;  %v333_v1 = vmul.f32 %v567_v0, %v559_v50 }
 0x394   : > { %v268_v61 = vpop.permute.xlu0 %267 }
 0x395   : > { %288 = vmatpush.msra.mxu3 %v268_v61 }
 0x396   : > { %520 = vmatmul.msk.f32.vlgmr.msra.gmra.mxu3 %vm159_vm0, %v266_v63 }
 0x397   : > { %355 = vmatpush.msrb.mxu3 %v335_v62 }
 0x39e   : > { %523 = vmatmul.msk.f32.vlgmr.msrb.gmra.mxu3 %vm159_vm0, %v333_v1 }
 0x415   : > { %v424_v2 = vpop.f32.mrf.mxu2 }
 0x416   : > { %436 = vrot.lane.b32.xlu1 %v424_v2, %s588_s29 }
 0x419   : > { %v290_v3 = vpop.f32.mrf.mxu3 }
 0x41a   : > { %428 = vrot.lane.b32.xlu0 %v290_v3, %s589_s30 }
 0x421   : > { %v357_v4 = vpop.f32.mrf.mxu3 }
 0x422   : > { %432 = vrot.lane.b32.xlu0 %v357_v4, %s590_s3 }
 0x488   : > { %v437_v8 = vpop.permute.xlu1 %436 }
 0x48c   : > { %v429_v5 = vpop.permute.xlu0 %428 }
 0x48d   : > { %v439_v6 = vsel %vm159_vm0, %v657_v30, %v429_v5 }
 0x494   : > { %v433_v7 = vpop.permute.xlu0 %432 }
 0x495   : > { %v441_v9 = vsel %vm440_vm3, %v439_v6, %v433_v7 }
 0x496   : > { %v443_v10 = vsel %vm442_vm4, %v441_v9, %v437_v8 }
 0x497   : > { %445 = vst.msk [vmem:[%s152_s6] sm:$0xff] %vm444_vm5, %v443_v10 }
 0x498 PF: > { %s12_s9 = sadd.s32 1, %s574_s9  }
 0x499   : > { %p9_p4 = scmp.ge.s32.totalorder %s12_s9, 4  }
 0x49b   :  { %11 = sbr.rel (!%p9_p4) target bundleno = 1 (0x1), region = 61 }

// kernel: custom_model_forward.15
= control target key start
LH: loop header
LB: loop body
LE: loop exit
PB: predicated region body
PF: predicated region fallthrough
CT: control target
= control target key end

     0   :  { %vm18_vm0 = vcmask 523264   ;;  %v183_v2 = vmov 0.0   ;;  %vm29_vm1 = vcmask 261120   ;;  %s255_s1 = inlined_call_operand.vmem [shape: f32[32,64], index: 1, kind: input, shape index: {}]   ;;  %s256_s2 = inlined_call_operand.vmem [shape: f32[1,64], index: 2, kind: input, shape index: {}]   ;;  %s257_s0 = inlined_call_operand.vmem [shape: f32[16,32], index: 0, kind: input, shape index: {}]   ;;  %s258_s3 = inlined_call_operand.vmem [shape: f32[16,64], index: 3, kind: output, shape index: {}]  }
   0x1   :  { %v28_v0 = vld [vmem:[%s255_s1 + $0x18] sm:$0xff]  ;;  %v27_v1 = vld [vmem:[%s255_s1 + $0x10] sm:$0xff]  ;;  %19 = vst.msk [vmem:[#allocation2] sm:$0xff] %vm18_vm0, %v183_v2  ;;  %v26_v3 = vld [vmem:[%s255_s1 + $0x8] sm:$0xff] }
   0x2   :  { %48 = vmatpush.msra.mxu0 %v28_v0  ;;  %173 = vmatpush.msra.mxu1 %v28_v0  ;;  %20 = vst.msk [vmem:[#allocation2 + $0x8] sm:$0xff] %vm18_vm0, %v183_v2  ;;  %v25_v4 = vld [vmem:[%s255_s1] sm:$0xff]  ;;  %v24_v6 = vld [vmem:[%s257_s0 + $0x8] sm:$0xff] }
   0x3   :  { %v23_v5 = vld [vmem:[%s257_s0] sm:$0xff] }
   0x4   :  { %49 = vmatpush.msra.mxu0 %v27_v1  ;;  %174 = vmatpush.msra.mxu1 %v27_v1  ;;  %v178_v13 = vld [vmem:[%s256_s2] ss:$0 sm:$0xff] }
   0x6   :  { %50 = vmatpush.msra.mxu0 %v26_v3  ;;  %175 = vmatpush.msra.mxu1 %v26_v3 }
   0x8   :  { %51 = vmatpush.msra.mxu0 %v25_v4  ;;  %176 = vmatpush.msra.mxu1 %v25_v4  ;;  %v21_v7 = vld [vmem:[#allocation2] sm:$0xff] }
   0x9   :  { %169 = vmatmul.msk.f32.vlgmr.msra.gmra.mxu0 %vm29_vm1, %v23_v5  ;;  %170 = vmatmul.msk.f32.vlgmr.msra.gmra.mxu1 %vm29_vm1, %v24_v6  ;;  %v22_v8 = vld [vmem:[#allocation2 + $0x8] sm:$0xff] }
  0x86   :  { %v53_v9 = vpop.f32.mrf.mxu0  ;;  %v56_v10 = vpop.f32.mrf.mxu1 }
  0x87   :  { %v59_v11 = vadd.f32 %v53_v9, %v21_v7  ;;  %v60_v12 = vadd.f32 %v56_v10, %v22_v8 }
  0x89   :  { %62 = vst.msk [vmem:[#allocation2] sm:$0xff] %vm18_vm0, %v59_v11 }
  0x8a   :  { %63 = vst.msk [vmem:[#allocation2 + $0x8] sm:$0xff] %vm18_vm0, %v60_v12 }
  0x90   :  { %v67_v14 = vld [vmem:[#allocation2] sm:$0xff] }
  0x91   :  { %v229_v15 = vadd.f32 %v178_v13, %v67_v14  ;;  %v68_v16 = vld [vmem:[#allocation2 + $0x8] sm:$0xff] }
  0x92   :  { %v231_v17 = vadd.f32 %v178_v13, %v68_v16 }
  0x93   :  { %v234_v18 = vmul.f32 0.70710677, %v229_v15 }
  0x94   :  { %v237_v19 = vmul.f32 0.70710677, %v231_v17 }
  0x95   :  { %v79_v20 = vmul.f32 %v234_v18, %v234_v18 }
  0x96   :  { %v119_v21 = vmul.f32 %v237_v19, %v237_v19 }
  0x97   :  { %v80_v22 = vmin.f32 %v79_v20, 16.0 }
  0x98   :  { %v120_v23 = vmin.f32 %v119_v21, 16.0 }
  0x99   :  { %v81_v24 = vmul.f32 2.1237322e-06, %v80_v22  ;;  %v92_v25 = vmul.f32 3.8918573e-05, %v80_v22 }
  0x9a   :  { %v121_v26 = vmul.f32 2.1237322e-06, %v120_v23  ;;  %v132_v27 = vmul.f32 3.8918573e-05, %v120_v23 }
  0x9b   :  { %v82_v28 = vadd.f32 0.00028619796, %v81_v24  ;;  %v93_v29 = vadd.f32 0.001143296, %v92_v25 }
  0x9c   :  { %v122_v30 = vadd.f32 0.00028619796, %v121_v26  ;;  %v133_v31 = vadd.f32 0.001143296, %v132_v27 }
  0x9d   :  { %v83_v32 = vmul.f32 %v82_v28, %v80_v22  ;;  %v94_v33 = vmul.f32 %v93_v29, %v80_v22 }
  0x9e   :  { %v123_v34 = vmul.f32 %v122_v30, %v120_v23  ;;  %v134_v35 = vmul.f32 %v133_v31, %v120_v23  ;;  %v75_v30 = vmul.f32 0.5, %v229_v15 }
  0x9f   :  { %v84_v36 = vadd.f32 0.0036580483, %v83_v32  ;;  %v95_v37 = vadd.f32 0.014752088, %v94_v33  ;;  %v76_v32 = vmul.f32 0.5, %v231_v17 }
  0xa0   :  { %v135_v38 = vadd.f32 0.014752088, %v134_v35  ;;  %v124_v40 = vadd.f32 0.0036580483, %v123_v34 }
  0xa1   :  { %v96_v39 = vmul.f32 %v95_v37, %v80_v22  ;;  %v85_v42 = vmul.f32 %v84_v36, %v80_v22 }
  0xa2   :  { %v136_v41 = vmul.f32 %v135_v38, %v120_v23  ;;  %v125_v46 = vmul.f32 %v124_v40, %v120_v23 }
  0xa3   :  { %v97_v43 = vadd.f32 0.112945676, %v96_v39  ;;  %v86_v48 = vadd.f32 0.05243302, %v85_v42 }
  0xa4   :  { %v137_v44 = vadd.f32 0.112945676, %v136_v41  ;;  %v126_v52 = vadd.f32 0.05243302, %v125_v46 }
  0xa5   :  { %v98_v45 = vmul.f32 %v97_v43, %v80_v22  ;;  %v87_v54 = vmul.f32 %v86_v48, %v80_v22 }
  0xa6   :  { %v138_v47 = vmul.f32 %v137_v44, %v120_v23  ;;  %v127_v57 = vmul.f32 %v126_v52, %v120_v23 }
  0xa7   :  { %v99_v49 = vadd.f32 0.4994258, %v98_v45  ;;  %v88_v58 = vadd.f32 0.18741608, %v87_v54 }
  0xa8   :  { %v139_v50 = vadd.f32 0.4994258, %v138_v47  ;;  %v128_v59 = vadd.f32 0.18741608, %v127_v57 }
  0xa9   :  { %v100_v51 = vmul.f32 %v99_v49, %v80_v22  ;;  %v89_v61 = vmul.f32 %v88_v58, %v80_v22 }
  0xaa   :  { %v140_v53 = vmul.f32 %v139_v50, %v120_v23  ;;  %v129_v0 = vmul.f32 %v128_v59, %v120_v23 }
  0xab   :  { %v101_v55 = vadd.f32 1.0, %v100_v51  ;;  %v90_v3 = vadd.f32 1.1283791, %v89_v61 }
  0xac   :  { %v141_v56 = vadd.f32 1.0, %v140_v53  ;;  %v130_v9 = vadd.f32 1.1283791, %v129_v0 }
  0xad   :  { %179 = vrcp.f32 %v101_v55  ;;  %v113_v4 = vand.u32 2147483648, %v101_v55  ;;  %v111_v7 = vand.u32 2147483647, %v101_v55  ;;  %vm107_vm4 = vweird.f32 %v101_v55 }
  0xae   :  { %181 = vrcp.f32 %v141_v56  ;;  %v153_v8 = vand.u32 2147483648, %v141_v56  ;;  %v151_v11 = vand.u32 2147483647, %v141_v56  ;;  %vm147_vm6 = vweird.f32 %v141_v56 }
  0xaf   :  { %v114_v13 = vor.u32 1.1754944e-38, %v113_v4  ;;  %v91_v16 = vmul.f32 %v90_v3, %v234_v18  ;;  %vm112_vm7 = vcmp.eq.f32.partialorder %v111_v7, 8.507059e+37  ;;  %v131_v23 = vmul.f32 %v130_v9, %v237_v19 }
  0xb0   :  { %v154_v21 = vor.u32 1.1754944e-38, %v153_v8  ;;  %vm152_vm9 = vcmp.eq.f32.partialorder %v151_v11, 8.507059e+37 }
  0xb3   :  { %v180_v60 = vpop.eup %179 }
  0xb4   :  { %v182_v62 = vpop.eup %181  ;;  %v103_v63 = vmul.f32 %v180_v60, %v101_v55  ;;  %vm108_vm2 = vweird.f32 %v180_v60 }
  0xb5   :  { %v143_v1 = vmul.f32 %v182_v62, %v141_v56  ;;  %vm148_vm3 = vweird.f32 %v182_v62  ;;  %vm109_vm5 = vmor %vm107_vm4, %vm108_vm2 }
  0xb6   :  { %v104_v2 = vsub.f32 1.0, %v103_v63  ;;  %vm149_vm8 = vmor %vm147_vm6, %vm148_vm3 }
  0xb7   :  { %v144_v5 = vsub.f32 1.0, %v143_v1 }
  0xb8   :  { %v105_v6 = vmul.f32 %v180_v60, %v104_v2 }
  0xb9   :  { %v145_v10 = vmul.f32 %v182_v62, %v144_v5 }
  0xba   :  { %v106_v12 = vadd.f32 %v180_v60, %v105_v6 }
  0xbb   :  { %v146_v14 = vadd.f32 %v182_v62, %v145_v10 }
  0xbc   :  { %v110_v20 = vsel %vm109_vm5, %v180_v60, %v106_v12 }
  0xbd   :  { %v115_v22 = vsel %vm112_vm7, %v114_v13, %v110_v20  ;;  %v150_v24 = vsel %vm149_vm8, %v182_v62, %v146_v14 }
  0xbe   :  { %v116_v25 = vmul.f32 %v115_v22, %v91_v16  ;;  %v155_v26 = vsel %vm152_vm9, %v154_v21, %v150_v24 }
  0xbf   :  { %v156_v27 = vmul.f32 %v155_v26, %v131_v23 }
  0xc0   :  { %v171_v28 = vclamps-f32 %v116_v25, 1.0 }
  0xc1   :  { %v172_v29 = vclamps-f32 %v156_v27, 1.0 }
  0xc2   :  { %v159_v31 = vadd.f32 1.0, %v171_v28 }
  0xc3   :  { %v160_v18 = vadd.f32 1.0, %v172_v29 }
  0xc4   :  { %v161_v33 = vmul.f32 %v159_v31, %v75_v30 }
  0xc5   :  { %v162_v34 = vmul.f32 %v160_v18, %v76_v32 }
  0xc6   :  { %163 = vst.msk [vmem:[%s258_s3] sm:$0xff] %vm18_vm0, %v161_v33 }
  0xc7   :  { %164 = vst.msk [vmem:[%s258_s3 + $0x8] sm:$0xff] %vm18_vm0, %v162_v34 }

// kernel: custom_model_forward.16
= control target key start
LH: loop header
LB: loop body
LE: loop exit
PB: predicated region body
PF: predicated region fallthrough
CT: control target
= control target key end

     0   :  { %vm27_vm0 = vcmask 261120   ;;  %v182_v2 = vmov 0.0   ;;  %vm42_vm1 = vcmask 523264   ;;  %v183_v28 = vmov 32.0   ;;  %s280_s1 = inlined_call_operand.vmem [shape: f32[64,32], index: 1, kind: input, shape index: {}]   ;;  %s281_s0 = inlined_call_operand.vmem [shape: f32[16,64], index: 0, kind: input, shape index: {}]   ;;  %s282_s2 = inlined_call_operand.vmem [shape: f32[1,32], index: 2, kind: input, shape index: {}]   ;;  %s283_s3 = inlined_call_operand.vmem [shape: f32[16,32], index: 3, kind: input, shape index: {}]   ;;  %s284_s4 = inlined_call_operand.vmem [shape: f32[1,32], index: 4, kind: input, shape index: {}]   ;;  %s285_s5 = inlined_call_operand.vmem [shape: f32[1,32], index: 5, kind: input, shape index: {}]   ;;  %s286_s6 = inlined_call_operand.vmem [shape: f32[16,32], index: 6, kind: output, shape index: {}]  }
   0x1   :  { %v41_v0 = vld [vmem:[%s280_s1 + $0x38] sm:$0xff]  ;;  %v40_v1 = vld [vmem:[%s280_s1 + $0x30] sm:$0xff]  ;;  %28 = vst.msk [vmem:[#allocation2] sm:$0xff] %vm27_vm0, %v182_v2  ;;  %v39_v3 = vld [vmem:[%s280_s1 + $0x28] sm:$0xff]  ;;  %176 = vrcp.f32 %v183_v28 }
   0x2   :  { %57 = vmatpush.msra.mxu0 %v41_v0  ;;  %163 = vmatpush.msra.mxu1 %v41_v0  ;;  %29 = vst.msk [vmem:[#allocation2 + $0x8] sm:$0xff] %vm27_vm0, %v182_v2  ;;  %v38_v4 = vld [vmem:[%s280_s1 + $0x20] sm:$0xff]  ;;  %v37_v5 = vld [vmem:[%s280_s1 + $0x18] sm:$0xff]  ;;  %v36_v6 = vld [vmem:[%s280_s1 + $0x10] sm:$0xff] }
   0x3   :  { %v35_v7 = vld [vmem:[%s280_s1 + $0x8] sm:$0xff]  ;;  %v34_v8 = vld [vmem:[%s280_s1] sm:$0xff] }
   0x4   :  { %58 = vmatpush.msra.mxu0 %v40_v1  ;;  %164 = vmatpush.msra.mxu1 %v40_v1  ;;  %v32_v9 = vld [vmem:[%s281_s0] sm:$0xff]  ;;  %v33_v10 = vld [vmem:[%s281_s0 + $0x8] sm:$0xff] }
   0x5   :  { %v173_v17 = vld [vmem:[%s282_s2] ss:$0 sm:$0xff]  ;;  %v89_v24 = vld [vmem:[%s283_s3 + $0x8] sm:$0xff] }
   0x6   :  { %59 = vmatpush.msra.mxu0 %v39_v3  ;;  %165 = vmatpush.msra.mxu1 %v39_v3  ;;  %v88_v19 = vld [vmem:[%s283_s3] sm:$0xff] }
   0x7   :  { %v177_v29 = vpop.eup %176  ;;  %v174_v59 = vld [vmem:[%s284_s4] ss:$0 sm:$0xff] }
   0x8   :  { %60 = vmatpush.msra.mxu0 %v38_v4  ;;  %166 = vmatpush.msra.mxu1 %v38_v4  ;;  %v30_v11 = vld [vmem:[#allocation2] sm:$0xff]  ;;  %v99_v30 = vmul.f32 32.0, %v177_v29  ;;  %vm103_vm2 = vweird.f32 %v177_v29 }
   0x9   :  { %v31_v12 = vld [vmem:[#allocation2 + $0x8] sm:$0xff]  ;;  %v175_v62 = vld [vmem:[%s285_s5] ss:$0 sm:$0xff] }
   0xa   :  { %61 = vmatpush.msra.mxu0 %v37_v5  ;;  %167 = vmatpush.msra.mxu1 %v37_v5  ;;  %v100_v31 = vsub.f32 1.0, %v99_v30 }
   0xc   :  { %62 = vmatpush.msra.mxu0 %v36_v6  ;;  %168 = vmatpush.msra.mxu1 %v36_v6  ;;  %v101_v32 = vmul.f32 %v177_v29, %v100_v31 }
   0xe   :  { %63 = vmatpush.msra.mxu0 %v35_v7  ;;  %169 = vmatpush.msra.mxu1 %v35_v7  ;;  %v102_v33 = vadd.f32 %v177_v29, %v101_v32 }
  0x10   :  { %64 = vmatpush.msra.mxu0 %v34_v8  ;;  %170 = vmatpush.msra.mxu1 %v34_v8  ;;  %v104_v34 = vsel %vm103_vm2, %v177_v29, %v102_v33 }
  0x11   :  { %161 = vmatmul.msk.f32.vlgmr.msra.gmra.mxu0 %vm42_vm1, %v32_v9  ;;  %162 = vmatmul.msk.f32.vlgmr.msra.gmra.mxu1 %vm42_vm1, %v33_v10 }
  0x8e   :  { %v66_v13 = vpop.f32.mrf.mxu0  ;;  %v69_v14 = vpop.f32.mrf.mxu1 }
  0x8f   :  { %v72_v15 = vadd.f32 %v66_v13, %v30_v11  ;;  %v73_v16 = vadd.f32 %v69_v14, %v31_v12 }
  0x91   :  { %75 = vst.msk [vmem:[#allocation2] sm:$0xff] %vm27_vm0, %v72_v15 }
  0x92   :  { %76 = vst.msk [vmem:[#allocation2 + $0x8] sm:$0xff] %vm27_vm0, %v73_v16 }
  0x98   :  { %v80_v18 = vld [vmem:[#allocation2] sm:$0xff] }
  0x99   :  { %v86_v20 = vadd.f32 %v173_v17, %v80_v18  ;;  %v81_v21 = vld [vmem:[#allocation2 + $0x8] sm:$0xff] }
  0x9a   :  { %v87_v23 = vadd.f32 %v173_v17, %v81_v21 }
  0x9b   :  { %v90_v22 = vadd.f32 %v88_v19, %v86_v20 }
  0x9c   :  { %v91_v26 = vadd.f32 %v89_v24, %v87_v23 }
  0x9d   :  { %v92_v25 = vsel %vm27_vm0, %v90_v22, 0.0 }
  0x9e   :  { %93 = vadd.xlane.f32.xlu0 %v92_v25  ;;  %v95_v27 = vsel %vm27_vm0, %v91_v26, 0.0 }
  0xa6   :  { %96 = vadd.xlane.f32.xlu0 %v95_v27 }
 0x111   :  { %v94_v35 = vpop.xlane.xlu0 %93 }
 0x112   :  { %v105_v36 = vmul.f32 %v104_v34, %v94_v35 }
 0x114   :  { %v107_v37 = vsub.f32 %v90_v22, %v105_v36 }
 0x116   :  { %v109_v38 = vmul.f32 %v107_v37, %v107_v37 }
 0x118   :  { %v111_v39 = vsel %vm27_vm0, %v109_v38, 0.0 }
 0x119   :  { %112 = vadd.xlane.f32.xlu1 %v111_v39  ;;  %v97_v40 = vpop.xlane.xlu0 %96 }
 0x11a   :  { %v106_v41 = vmul.f32 %v104_v34, %v97_v40 }
 0x11c   :  { %v108_v42 = vsub.f32 %v91_v26, %v106_v41 }
 0x11e   :  { %v110_v43 = vmul.f32 %v108_v42, %v108_v42 }
 0x120   :  { %v114_v44 = vsel %vm27_vm0, %v110_v43, 0.0 }
 0x121   :  { %115 = vadd.xlane.f32.xlu1 %v114_v44 }
 0x18c   :  { %v113_v45 = vpop.xlane.xlu1 %112 }
 0x18d   :  { %v117_v46 = vmul.f32 %v113_v45, %v104_v34 }
 0x18f   :  { %v119_v47 = vadd.f32 1e-12, %v117_v46 }
 0x191   :  { %178 = vrsqrt.f32 %v119_v47  ;;  %vm127_vm4 = vweird.f32 %v119_v47 }
 0x194   :  { %v116_v48 = vpop.xlane.xlu1 %115 }
 0x195   :  { %v118_v49 = vmul.f32 %v116_v48, %v104_v34 }
 0x197   :  { %v179_v50 = vpop.eup %178  ;;  %v120_v51 = vadd.f32 1e-12, %v118_v49 }
 0x198   :  { %v122_v52 = vmul.f32 %v179_v50, %v119_v47  ;;  %vm128_vm3 = vweird.f32 %v179_v50 }
 0x199   :  { %180 = vrsqrt.f32 %v120_v51  ;;  %vm129_vm5 = vmor %vm127_vm4, %vm128_vm3  ;;  %vm137_vm7 = vweird.f32 %v120_v51 }
 0x19a   :  { %v123_v53 = vmul.f32 %v179_v50, %v122_v52 }
 0x19c   :  { %v124_v54 = vmul.f32 0.5, %v123_v53 }
 0x19e   :  { %v125_v55 = vsub.f32 1.5, %v124_v54 }
 0x19f   :  { %v181_v56 = vpop.eup %180 }
 0x1a0   :  { %v126_v57 = vmul.f32 %v179_v50, %v125_v55  ;;  %v132_v58 = vmul.f32 %v181_v56, %v120_v51  ;;  %vm138_vm6 = vweird.f32 %v181_v56 }
 0x1a1   :  { %vm139_vm8 = vmor %vm137_vm7, %vm138_vm6 }
 0x1a2   :  { %v130_v60 = vsel %vm129_vm5, %v179_v50, %v126_v57  ;;  %v133_v61 = vmul.f32 %v181_v56, %v132_v58 }
 0x1a3   :  { %v141_v63 = vmul.f32 %v130_v60, %v107_v37 }
 0x1a4   :  { %v134_v0 = vmul.f32 0.5, %v133_v61 }
 0x1a5   :  { %v147_v1 = vmul.f32 %v174_v59, %v141_v63 }
 0x1a6   :  { %v135_v2 = vsub.f32 1.5, %v134_v0 }
 0x1a7   :  { %v153_v3 = vadd.f32 %v175_v62, %v147_v1 }
 0x1a8   :  { %v136_v4 = vmul.f32 %v181_v56, %v135_v2 }
 0x1a9   :  { %155 = vst.msk [vmem:[%s286_s6] sm:$0xff] %vm27_vm0, %v153_v3 }
 0x1aa   :  { %v140_v5 = vsel %vm139_vm8, %v181_v56, %v136_v4 }
 0x1ab   :  { %v142_v6 = vmul.f32 %v140_v5, %v108_v42 }
 0x1ad   :  { %v148_v7 = vmul.f32 %v174_v59, %v142_v6 }
 0x1af   :  { %v154_v8 = vadd.f32 %v175_v62, %v148_v7 }
 0x1b1   :  { %156 = vst.msk [vmem:[%s286_s6 + $0x8] sm:$0xff] %vm27_vm0, %v154_v8 }

// kernel: custom_model_forward.21
= control target key start
LH: loop header
LB: loop body
LE: loop exit
PB: predicated region body
PF: predicated region fallthrough
CT: control target
= control target key end

     0   :  { %s390_s0 = inlined_call_operand.vmem [shape: f32[16,64], index: 0, kind: input, shape index: {}]   ;;  %s391_s1 = inlined_call_operand.vmem [shape: f32[64,32], index: 1, kind: input, shape index: {}]   ;;  %s392_s2 = inlined_call_operand.vmem [shape: f32[1,32], index: 2, kind: input, shape index: {}]   ;;  %s393_s3 = inlined_call_operand.vmem [shape: f32[16,32], index: 3, kind: input, shape index: {}]   ;;  %s394_s4 = inlined_call_operand.vmem [shape: f32[1,32], index: 4, kind: input, shape index: {}]   ;;  %s395_s5 = inlined_call_operand.vmem [shape: f32[1,32], index: 5, kind: input, shape index: {}]   ;;  %s396_s6 = inlined_call_operand.vmem [shape: f32[1,32], index: 6, kind: input, shape index: {}]   ;;  %s397_s7 = inlined_call_operand.<no memory space> [shape: f32[1,1], index: 7, kind: input, shape index: {}]   ;;  %s398_s8 = inlined_call_operand.hbm [shape: f32[16,32], index: 8, kind: output, shape index: {0}]   ;;  %s399_s9 = inlined_call_operand.vmem [shape: f32[16,1], index: 9, kind: output, shape index: {1}]  }
   0x1   :  { %v15_v0 = vstv %s397_s7 }
   0x2   :  { %16 = vst [vmem:[#allocation3] sm:$0x1] %v15_v0 }
   0x3   :  { %v52_v1 = vld [vmem:[%s391_s1 + $0x38] sm:$0xff]  ;;  %v51_v2 = vld [vmem:[%s391_s1 + $0x30] sm:$0xff]  ;;  %vm38_vm0 = vcmask 261120   ;;  %v263_v3 = vmov 0.0   ;;  %v50_v4 = vld [vmem:[%s391_s1 + $0x28] sm:$0xff] }
   0x4   :  { %68 = vmatpush.msra.mxu0 %v52_v1  ;;  %213 = vmatpush.msra.mxu1 %v52_v1  ;;  %39 = vst.msk [vmem:[#allocation2] sm:$0xff] %vm38_vm0, %v263_v3  ;;  %v49_v5 = vld [vmem:[%s391_s1 + $0x20] sm:$0xff] }
   0x5   :  { %40 = vst.msk [vmem:[#allocation2 + $0x8] sm:$0xff] %vm38_vm0, %v263_v3 }
   0x6   :  { %69 = vmatpush.msra.mxu0 %v51_v2  ;;  %214 = vmatpush.msra.mxu1 %v51_v2 }
   0x8   :  { %70 = vmatpush.msra.mxu0 %v50_v4  ;;  %215 = vmatpush.msra.mxu1 %v50_v4 }
   0x9   :  { %17 = vsyncpa [#allocation5], 0  ;;  %v48_v6 = vld [vmem:[%s391_s1 + $0x18] sm:$0xff]  ;;  %v47_v7 = vld [vmem:[%s391_s1 + $0x10] sm:$0xff]  ;;  %vm53_vm1 = vcmask 523264   ;;  %v264_v29 = vmov 32.0  }
   0xa   :  { %71 = vmatpush.msra.mxu0 %v49_v5  ;;  %216 = vmatpush.msra.mxu1 %v49_v5  ;;  %v46_v8 = vld [vmem:[%s391_s1 + $0x8] sm:$0xff]  ;;  %v45_v9 = vld [vmem:[%s391_s1] sm:$0xff]  ;;  %231 = vrcp.f32 %v264_v29  ;;  %s195_s18 = sshll.u32 %s398_s8, 4  ;;  %s267_s19 = smov 8   ;;  %vm186_vm9 = vcmask 7168   ;;  %s196_s18 = int_to_ptr.hbm [resolvable:$true] %s195_s18 }
   0xb   :  { %v43_v10 = vld [vmem:[%s390_s0] sm:$0xff]  ;;  %v44_v11 = vld [vmem:[%s390_s0 + $0x8] sm:$0xff] }
   0xc   :  { %72 = vmatpush.msra.mxu0 %v48_v6  ;;  %217 = vmatpush.msra.mxu1 %v48_v6  ;;  %v41_v12 = vld [vmem:[#allocation2] sm:$0xff]  ;;  %v42_v13 = vld [vmem:[#allocation2 + $0x8] sm:$0xff] }
   0xd   :  { %v226_v18 = vld [vmem:[%s392_s2] ss:$0 sm:$0xff]  ;;  %v100_v25 = vld [vmem:[%s393_s3 + $0x8] sm:$0xff] }
   0xe   :  { %73 = vmatpush.msra.mxu0 %v47_v7  ;;  %218 = vmatpush.msra.mxu1 %v47_v7  ;;  %v99_v20 = vld [vmem:[%s393_s3] sm:$0xff] }
   0xf   :  { %v227_v60 = vld [vmem:[%s394_s4] ss:$0 sm:$0xff]  ;;  %s265_s4 = smov [#allocation4]  }
  0x10   :  { %74 = vmatpush.msra.mxu0 %v46_v8  ;;  %219 = vmatpush.msra.mxu1 %v46_v8  ;;  %v232_v30 = vpop.eup %231  ;;  %v228_v0 = vld [vmem:[%s395_s5] ss:$0 sm:$0xff]  ;;  %s193_s5 = sshll.u32 %s265_s4, 4  ;;  %s194_s5 = int_to_ptr.vmem [resolvable:$true] %s193_s5 }
  0x11   :  { %v110_v31 = vmul.f32 32.0, %v232_v30  ;;  %vm114_vm2 = vweird.f32 %v232_v30  ;;  %v229_v3 = vld [vmem:[%s396_s6] ss:$0 sm:$0xff]  ;;  %s266_s6 = smov 128  }
  0x12   :  { %75 = vmatpush.msra.mxu0 %v45_v9  ;;  %220 = vmatpush.msra.mxu1 %v45_v9 }
  0x13   :  { %211 = vmatmul.msk.f32.vlgmr.msra.gmra.mxu0 %vm53_vm1, %v43_v10  ;;  %212 = vmatmul.msk.f32.vlgmr.msra.gmra.mxu1 %vm53_vm1, %v44_v11  ;;  %v111_v32 = vsub.f32 1.0, %v110_v31 }
  0x15   :  { %v112_v33 = vmul.f32 %v232_v30, %v111_v32 }
  0x17   :  { %v113_v34 = vadd.f32 %v232_v30, %v112_v33 }
  0x19   :  { %v115_v35 = vsel %vm114_vm2, %v232_v30, %v113_v34 }
  0x90   :  { %v77_v14 = vpop.f32.mrf.mxu0  ;;  %v80_v15 = vpop.f32.mrf.mxu1 }
  0x91   :  { %v83_v16 = vadd.f32 %v77_v14, %v41_v12  ;;  %v84_v17 = vadd.f32 %v80_v15, %v42_v13  ;;  %v230_v15 = vld [vmem:[#allocation3] ss:$0 sm:$0xff] }
  0x93   :  { %86 = vst.msk [vmem:[#allocation2] sm:$0xff] %vm38_vm0, %v83_v16 }
  0x94   :  { %87 = vst.msk [vmem:[#allocation2 + $0x8] sm:$0xff] %vm38_vm0, %v84_v17 }
  0x9a   :  { %v91_v19 = vld [vmem:[#allocation2] sm:$0xff] }
  0x9b   :  { %v97_v21 = vadd.f32 %v226_v18, %v91_v19  ;;  %v92_v22 = vld [vmem:[#allocation2 + $0x8] sm:$0xff] }
  0x9c   :  { %v98_v24 = vadd.f32 %v226_v18, %v92_v22 }
  0x9d   :  { %v101_v23 = vadd.f32 %v99_v20, %v97_v21 }
  0x9e   :  { %v102_v27 = vadd.f32 %v100_v25, %v98_v24 }
  0x9f   :  { %v103_v26 = vsel %vm38_vm0, %v101_v23, 0.0 }
  0xa0   :  { %104 = vadd.xlane.f32.xlu0 %v103_v26  ;;  %v106_v28 = vsel %vm38_vm0, %v102_v27, 0.0 }
  0xa8   :  { %107 = vadd.xlane.f32.xlu0 %v106_v28 }
 0x113   :  { %v105_v36 = vpop.xlane.xlu0 %104 }
 0x114   :  { %v116_v37 = vmul.f32 %v115_v35, %v105_v36 }
 0x116   :  { %v118_v38 = vsub.f32 %v101_v23, %v116_v37 }
 0x118   :  { %v120_v39 = vmul.f32 %v118_v38, %v118_v38 }
 0x11a   :  { %v122_v40 = vsel %vm38_vm0, %v120_v39, 0.0 }
 0x11b   :  { %123 = vadd.xlane.f32.xlu1 %v122_v40  ;;  %v108_v41 = vpop.xlane.xlu0 %107 }
 0x11c   :  { %v117_v42 = vmul.f32 %v115_v35, %v108_v41 }
 0x11e   :  { %v119_v43 = vsub.f32 %v102_v27, %v117_v42 }
 0x120   :  { %v121_v44 = vmul.f32 %v119_v43, %v119_v43 }
 0x122   :  { %v125_v45 = vsel %vm38_vm0, %v121_v44, 0.0 }
 0x123   :  { %126 = vadd.xlane.f32.xlu1 %v125_v45 }
 0x18e   :  { %v124_v46 = vpop.xlane.xlu1 %123 }
 0x18f   :  { %v128_v47 = vmul.f32 %v124_v46, %v115_v35 }
 0x191   :  { %v130_v48 = vadd.f32 1e-12, %v128_v47 }
 0x193   :  { %233 = vrsqrt.f32 %v130_v48  ;;  %vm138_vm4 = vweird.f32 %v130_v48 }
 0x196   :  { %v127_v49 = vpop.xlane.xlu1 %126 }
 0x197   :  { %v129_v50 = vmul.f32 %v127_v49, %v115_v35 }
 0x199   :  { %v234_v51 = vpop.eup %233  ;;  %v131_v52 = vadd.f32 1e-12, %v129_v50 }
 0x19a   :  { %v133_v53 = vmul.f32 %v234_v51, %v130_v48  ;;  %vm139_vm3 = vweird.f32 %v234_v51 }
 0x19b   :  { %235 = vrsqrt.f32 %v131_v52  ;;  %vm140_vm5 = vmor %vm138_vm4, %vm139_vm3  ;;  %vm148_vm7 = vweird.f32 %v131_v52 }
 0x19c   :  { %v134_v54 = vmul.f32 %v234_v51, %v133_v53 }
 0x19e   :  { %v135_v55 = vmul.f32 0.5, %v134_v54 }
 0x1a0   :  { %v136_v56 = vsub.f32 1.5, %v135_v55 }
 0x1a1   :  { %v236_v57 = vpop.eup %235 }
 0x1a2   :  { %v137_v58 = vmul.f32 %v234_v51, %v136_v56  ;;  %v143_v59 = vmul.f32 %v236_v57, %v131_v52  ;;  %vm149_vm6 = vweird.f32 %v236_v57 }
 0x1a3   :  { %vm150_vm8 = vmor %vm148_vm7, %vm149_vm6 }
 0x1a4   :  { %v144_v61 = vmul.f32 %v236_v57, %v143_v59  ;;  %v141_v62 = vsel %vm140_vm5, %v234_v51, %v137_v58 }
 0x1a5   :  { %v152_v63 = vmul.f32 %v141_v62, %v118_v38 }
 0x1a6   :  { %v145_v1 = vmul.f32 0.5, %v144_v61 }
 0x1a7   :  { %v158_v2 = vmul.f32 %v227_v60, %v152_v63 }
 0x1a8   :  { %v146_v4 = vsub.f32 1.5, %v145_v1 }
 0x1a9   :  { %v164_v5 = vadd.f32 %v228_v0, %v158_v2 }
 0x1aa   :  { %v147_v6 = vmul.f32 %v236_v57, %v146_v4 }
 0x1ab   :  { %v172_v7 = vmul.f32 %v229_v3, %v164_v5  ;;  %166 = vst.msk [vmem:[#allocation4] sm:$0xff] %vm38_vm0, %v164_v5 }
 0x1ac   :  { %v151_v8 = vsel %vm150_vm8, %v236_v57, %v147_v6 }
 0x1ad   :  { %v174_v9 = vsel %vm38_vm0, %v172_v7, 0.0  ;;  %v153_v10 = vmul.f32 %v151_v8, %v119_v43 }
 0x1ae   :  { %175 = vadd.xlane.f32.xlu2 %v174_v9 }
 0x1af   :  { %v159_v11 = vmul.f32 %v227_v60, %v153_v10 }
 0x1b1   :  { %v165_v12 = vadd.f32 %v228_v0, %v159_v11 }
 0x1b3   :  { %v173_v13 = vmul.f32 %v229_v3, %v165_v12  ;;  %167 = vst.msk [vmem:[#allocation4 + $0x8] sm:$0xff] %vm38_vm0, %v165_v12 }
 0x1b4   :  { %201 = dma.vmem_to_hbm [thread:$0]  %s194_s5, 256, %s196_s18, [#allocation5], %s266_s6, %s266_s6, %s267_s19  }
 0x1b5   :  { %v177_v14 = vsel %vm38_vm0, %v173_v13, 0.0 }
 0x1b6   :  { %178 = vadd.xlane.f32.xlu2 %v177_v14 }
 0x221   :  { %v176_v16 = vpop.xlane.xlu2 %175 }
 0x222   :  { %v184_v17 = vadd.f32 %v230_v15, %v176_v16 }
 0x224   :  { %187 = vst.msk [vmem:[%s399_s9] sm:$0xff] %vm186_vm9, %v184_v17 }
 0x229   :  { %v179_v18 = vpop.xlane.xlu2 %178 }
 0x22a   :  { %v185_v19 = vadd.f32 %v230_v15, %v179_v18 }
 0x22c   :  { %188 = vst.msk [vmem:[%s399_s9 + $0x8] sm:$0xff] %vm186_vm9, %v185_v19 }
 0x22d   :  { %261 = dma.done.wait [#allocation5], 256  }
 0x22e   :  { %262 = vsyncadd [#allocation5], 4294967040 }
 0x22f   :  { %210 = vsyncpa [#allocation5], 1 }

</bundles_post_ra>
